<compile_context>
chip_gen: v6e
topology: v6e:2x2x1
jax: 0.10.0
libtpu: 0.0.40
codegen_flags: <defaults>
</compile_context>

<pallas_src>
import functools

import jax
import jax.numpy as jnp
from jax.experimental import pallas as pl
from jax.experimental.pallas import tpu as pltpu

_BN_EPS = 1e-5


# ---------------------------------------------------------------------------
# Generation-aware sizing helpers
# ---------------------------------------------------------------------------
def _vmem_limit_bytes():
    try:
        cap = pltpu.get_tpu_info().vmem_capacity_bytes  # 64 MiB on v7x, 128 on v5e/v6e
    except Exception:
        cap = 64 << 20
    return int(min(cap // 2, 64 << 20))


def _largest_divisor_leq(n, target):
    target = max(1, min(n, target))
    for d in range(target, 0, -1):
        if n % d == 0:
            return d
    return 1


def _pick_row_tile(ho, wi, ci, cout):
    """Output rows per block so that (bf16 window + f32 y block), double
    buffered, stays a few MiB (v7x has the smallest VMEM)."""
    budget = 2 << 20
    per_row = wi * ci * 2 + wi * cout * 4 + 1
    return _largest_divisor_leq(ho, max(1, budget // per_row))


def _pick_m_tile(m, c):
    """Row tile for the elementwise BN/ReLU pass; multiple of 8 or full M."""
    budget = 4 << 20
    target = max(8, budget // (c * 8))
    if m <= target:
        return m
    best = None
    for d in range(8, target + 1, 8):
        if m % d == 0:
            best = d
    return best if best is not None else m


# ---------------------------------------------------------------------------
# Kernel 1: stride-1 kh x kw conv on a halo'd row window + BN partial stats
# ---------------------------------------------------------------------------
def _conv_stats_kernel(xwin_ref, w_ref, y_ref, stats_ref, *, kh, kw):
    """xwin_ref : (TRI, Wi, Ci)  bf16, TRI = TR + kh - 1 (row halo included)
       w_ref    : (kh*kw*Ci, Co) bf16, K index = (dh*kw + dw)*Ci + ci
       y_ref    : (TR, Wo, Co)   f32  pre-BN conv output, Wo = Wi - kw + 1
       stats_ref: (2, Co)        f32  [sum; sum of squares] over this block"""
    tr, wo, co = y_ref.shape
    # In-kernel tap generation: contiguous slices of the halo'd window,
    # concatenated along K so the whole conv is a single MXU dot.
    taps = [
        xwin_ref[pl.ds(dh, tr), pl.ds(dw, wo), :].reshape(tr * wo, -1)
        for dh in range(kh) for dw in range(kw)
    ]
    patches = jnp.concatenate(taps, axis=-1)                    # (TR*Wo, kh*kw*Ci)
    y = jnp.dot(patches, w_ref[...], preferred_element_type=jnp.float32)
    y_ref[...] = y.reshape(tr, wo, co)
    stats_ref[pl.ds(0, 1), :] = jnp.sum(y, axis=0, keepdims=True)
    stats_ref[pl.ds(1, 1), :] = jnp.sum(y * y, axis=0, keepdims=True)


def _conv_bn_stats(xwin, w_packed, kh, kw, ho, wo, cout):
    """xwin: (N, RB, TRI, Wi, Ci) bf16 row windows. Returns pre-BN conv output
    y (N, Ho, Wo, Co) f32 and per-channel batch (mean, var)."""
    n, rb, tri, wi, ci = xwin.shape
    tr = tri - (kh - 1)
    assert rb * tr == ho and wi - (kw - 1) == wo
    assert w_packed.shape == (kh * kw * ci, cout)

    y, stats = pl.pallas_call(
        functools.partial(_conv_stats_kernel, kh=kh, kw=kw),
        grid=(n, rb),
        in_specs=[
            pl.BlockSpec((None, None, tri, wi, ci), lambda i, j: (i, j, 0, 0, 0)),
            pl.BlockSpec((kh * kw * ci, cout), lambda i, j: (0, 0)),
        ],
        out_specs=(
            pl.BlockSpec((None, tr, wo, cout), lambda i, j: (i, j, 0, 0)),
            pl.BlockSpec((None, None, 2, cout), lambda i, j: (i, j, 0, 0)),
        ),
        out_shape=(
            jax.ShapeDtypeStruct((n, ho, wo, cout), jnp.float32),
            jax.ShapeDtypeStruct((n, rb, 2, cout), jnp.float32),
        ),
        compiler_params=pltpu.CompilerParams(
            dimension_semantics=("parallel", "parallel"),
            vmem_limit_bytes=_vmem_limit_bytes()),
    )(xwin, w_packed)

    count = n * ho * wo
    sums = jnp.sum(stats, axis=(0, 1))                           # (2, Cout), tiny
    mean = sums[0] / count
    var = jnp.maximum(sums[1] / count - mean * mean, 0.0)        # biased variance
    return y, mean, var


# ---------------------------------------------------------------------------
# Kernel 2: BatchNorm apply (precomputed scale/shift) + ReLU epilogue
# ---------------------------------------------------------------------------
def _bn_relu_kernel(y_ref, scale_ref, shift_ref, o_ref):
    y = y_ref[...]
    o_ref[...] = jnp.maximum(y * scale_ref[...] + shift_ref[...], 0.0).astype(o_ref.dtype)


def _bn_relu(y, mean, var, gamma, beta, out_dtype):
    n, ho, wo, c = y.shape
    m = n * ho * wo
    inv_std = jax.lax.rsqrt(var + _BN_EPS)
    scale = (gamma * inv_std).reshape(1, c).astype(jnp.float32)
    shift = (beta - mean * gamma * inv_std).reshape(1, c).astype(jnp.float32)
    tm = _pick_m_tile(m, c)
    out = pl.pallas_call(
        _bn_relu_kernel,
        grid=(m // tm,),
        in_specs=[
            pl.BlockSpec((tm, c), lambda i: (i, 0)),
            pl.BlockSpec((1, c), lambda i: (0, 0)),
            pl.BlockSpec((1, c), lambda i: (0, 0)),
        ],
        out_specs=pl.BlockSpec((tm, c), lambda i: (i, 0)),
        out_shape=jax.ShapeDtypeStruct((m, c), out_dtype),
        compiler_params=pltpu.CompilerParams(
            dimension_semantics=("parallel",),
            vmem_limit_bytes=_vmem_limit_bytes()),
    )(y.reshape(m, c), scale, shift)
    return out.reshape(n, ho, wo, c)


# ---------------------------------------------------------------------------
# Plain-JAX glue (layout only — all FLOP-heavy work is in the kernels)
# ---------------------------------------------------------------------------
def _row_windows(x, tr, tri):
    """(N, Hin, Wi, C) -> (N, RB, tri, Wi, C); window rb = rows [rb*tr, rb*tr+tri).
    Only the small row halo is duplicated (<= 2 rows per block)."""
    n, hin, wi, c = x.shape
    rb = (hin - tri) // tr + 1
    wins = [jax.lax.dynamic_slice_in_dim(x, r * tr, tri, axis=1) for r in range(rb)]
    return jnp.stack(wins, axis=1)


def _space_to_depth2(xp):
    """(N, 2I, 2J, C) -> (N, I, J, 4C), channel order c' = (rh*2 + rw)*C + c."""
    n, h2, w2, c = xp.shape
    z = xp.reshape(n, h2 // 2, 2, w2 // 2, 2, c)
    z = jnp.transpose(z, (0, 1, 3, 2, 4, 5))
    return z.reshape(n, h2 // 2, w2 // 2, 4 * c)


def down_forward(x_nchw, params):
    """Equivalent of down(in_ch, out_ch).forward(x); NCHW f32 in/out."""
    x = jnp.transpose(x_nchw, (0, 2, 3, 1)).astype(jnp.float32)       # NHWC
    n, h, w, cin = x.shape
    # TODO(synk): odd H/W for the stride-2 conv (space-to-depth path assumes even dims).
    assert h % 2 == 0 and w % 2 == 0
    ho, wo = h // 2, w // 2
    cout = params["w1"].shape[-1]

    # conv1: 3x3 stride-2 pad-1  ==  2x2 stride-1 conv on space-to-depth input
    xp = jnp.pad(x, ((0, 0), (1, 1), (1, 1), (0, 0)))
    z = _space_to_depth2(xp).astype(jnp.bfloat16)                     # (N, Ho+1, Wo+1, 4Cin)
    tr1 = _pick_row_tile(ho, wo + 1, 4 * cin, cout)
    zwin = _row_windows(z, tr1, tr1 + 1)
    y1, mean1, var1 = _conv_bn_stats(zwin, params["w1"], 2, 2, ho, wo, cout)
    a1 = _bn_relu(y1, mean1, var1, params["g1"], params["be1"], jnp.bfloat16)

    # conv2: 3x3 stride-1 pad-1
    a1p = jnp.pad(a1, ((0, 0), (1, 1), (1, 1), (0, 0)))
    tr2 = _pick_row_tile(ho, wo + 2, cout, cout)
    awin = _row_windows(a1p, tr2, tr2 + 2)
    y2, mean2, var2 = _conv_bn_stats(awin, params["w2"], 3, 3, ho, wo, cout)
    out = _bn_relu(y2, mean2, var2, params["g2"], params["be2"], jnp.float32)

    return jnp.transpose(out, (0, 3, 1, 2))                           # NCHW


# ---------------------------------------------------------------------------
# Parameter packing (PyTorch OIHW weights -> kernel matmul layouts, bf16)
# ---------------------------------------------------------------------------
def _pack_w_stride1(w_oihw):
    """(Cout, Cin, 3, 3) -> (9*Cin, Cout), K = (dh*3 + dw)*Cin + ci."""
    co, ci, kh, kw = w_oihw.shape
    w = jnp.transpose(w_oihw, (2, 3, 1, 0)).reshape(kh * kw * ci, co)
    return w.astype(jnp.bfloat16)


def _pack_w_stride2(w_oihw):
    """3x3 stride-2 weights as a 2x2 conv over the space-to-depth(2) input.
    (Cout, Cin, 3, 3) -> (16*Cin, Cout), K = ((ah*2+aw)*4 + rh*2 + rw)*Cin + ci,
    original tap (dh, dw) = (2*ah + rh, 2*aw + rw); taps with dh>2 or dw>2 are 0."""
    co, ci, _, _ = w_oihw.shape
    w = jnp.transpose(w_oihw, (2, 3, 1, 0))                           # (3, 3, Cin, Cout)
    w4 = jnp.zeros((4, 4, ci, co), jnp.float32).at[:3, :3].set(w)     # (dh', dw', ci, co)
    w4 = w4.reshape(2, 2, 2, 2, ci, co)                               # (ah, rh, aw, rw, ci, co)
    w4 = jnp.transpose(w4, (0, 2, 1, 3, 4, 5))                        # (ah, aw, rh, rw, ci, co)
    return w4.reshape(16 * ci, co).astype(jnp.bfloat16)


def init_params(key, in_ch, out_ch):
    """Deterministic synthetic params. Conv biases are omitted: with batch-stat
    BatchNorm directly after each conv they are exactly cancelled by the mean."""
    ks = jax.random.split(key, 6)
    w1 = 0.1 * jax.random.normal(ks[0], (out_ch, in_ch, 3, 3), jnp.float32)
    g1 = 1.0 + 0.1 * jax.random.normal(ks[1], (out_ch,), jnp.float32)
    be1 = 0.1 * jax.random.normal(ks[2], (out_ch,), jnp.float32)
    w2 = 0.1 * jax.random.normal(ks[3], (out_ch, out_ch, 3, 3), jnp.float32)
    g2 = 1.0 + 0.1 * jax.random.normal(ks[4], (out_ch,), jnp.float32)
    be2 = 0.1 * jax.random.normal(ks[5], (out_ch,), jnp.float32)
    return {
        "w1": _pack_w_stride2(w1), "g1": g1, "be1": be1,
        "w2": _pack_w_stride1(w2), "g2": g2, "be2": be2,
    }


if __name__ == "__main__":
    key = jax.random.PRNGKey(0)
    kx, kp = jax.random.split(key)
    in_ch, out_ch = 8, 16
    x = jax.random.normal(kx, (2, in_ch, 16, 16), jnp.float32)        # NCHW
    params = init_params(kp, in_ch, out_ch)

    out = jax.jit(down_forward)(x, params)
    jax.block_until_ready(out)
    assert out.shape == (2, out_ch, 8, 8), out.shape
    assert out.dtype == jnp.float32
    print("KERNEL_OK")
</pallas_src>

<mosaic_0001>
module attributes {stable_mosaic.version = 11 : i64} {
  func.func @_conv_stats_kernel(%arg0: i32, %arg1: i32, %arg2: memref<1x1x9x9x32xbf16, #tpu.memory_space<vmem>>, %arg3: memref<128x16xbf16, #tpu.memory_space<vmem>>, %arg4: memref<1x8x8x16xf32, #tpu.memory_space<vmem>>, %arg5: memref<1x1x2x16xf32, #tpu.memory_space<vmem>>) attributes {dimension_semantics = [#tpu.dimension_semantics<parallel>, #tpu.dimension_semantics<parallel>], iteration_bounds = array<i64: 2, 1>, scalar_prefetch = 0 : i64, scratch_operands = 0 : i64, tpu.core_type = #tpu.core_type<tc>, window_params = [{transform_indices = @transform_0, window_bounds = array<i64: 1, 1, 9, 9, 32>}, {pipeline_mode = #tpu.pipeline_mode<synchronous>, transform_indices = @transform_1, window_bounds = array<i64: 128, 16>}, {transform_indices = @transform_2, window_bounds = array<i64: 1, 8, 8, 16>}, {transform_indices = @transform_3, window_bounds = array<i64: 1, 1, 2, 16>}]} {
    %c0 = arith.constant 0 : index
    %c0_0 = arith.constant 0 : index
    %c0_1 = arith.constant 0 : index
    %c0_2 = arith.constant 0 : index
    %c0_3 = arith.constant 0 : index
    %0 = vector.load %arg2[%c0, %c0_0, %c0_1, %c0_2, %c0_3] : memref<1x1x9x9x32xbf16, #tpu.memory_space<vmem>>, vector<1x1x8x8x32xbf16>
    %1 = vector.shape_cast %0 : vector<1x1x8x8x32xbf16> to vector<8x8x32xbf16>
    %2 = vector.shape_cast %1 : vector<8x8x32xbf16> to vector<64x32xbf16>
    %c0_4 = arith.constant 0 : index
    %c0_5 = arith.constant 0 : index
    %c0_6 = arith.constant 0 : index
    %c1 = arith.constant 1 : index
    %c0_7 = arith.constant 0 : index
    %3 = vector.load %arg2[%c0_4, %c0_5, %c0_6, %c1, %c0_7] : memref<1x1x9x9x32xbf16, #tpu.memory_space<vmem>>, vector<1x1x8x8x32xbf16>
    %4 = vector.shape_cast %3 : vector<1x1x8x8x32xbf16> to vector<8x8x32xbf16>
    %5 = vector.shape_cast %4 : vector<8x8x32xbf16> to vector<64x32xbf16>
    %c0_8 = arith.constant 0 : index
    %c0_9 = arith.constant 0 : index
    %c1_10 = arith.constant 1 : index
    %c0_11 = arith.constant 0 : index
    %c0_12 = arith.constant 0 : index
    %6 = vector.load %arg2[%c0_8, %c0_9, %c1_10, %c0_11, %c0_12] : memref<1x1x9x9x32xbf16, #tpu.memory_space<vmem>>, vector<1x1x8x8x32xbf16>
    %7 = vector.shape_cast %6 : vector<1x1x8x8x32xbf16> to vector<8x8x32xbf16>
    %8 = vector.shape_cast %7 : vector<8x8x32xbf16> to vector<64x32xbf16>
    %c0_13 = arith.constant 0 : index
    %c0_14 = arith.constant 0 : index
    %c1_15 = arith.constant 1 : index
    %c1_16 = arith.constant 1 : index
    %c0_17 = arith.constant 0 : index
    %9 = vector.load %arg2[%c0_13, %c0_14, %c1_15, %c1_16, %c0_17] : memref<1x1x9x9x32xbf16, #tpu.memory_space<vmem>>, vector<1x1x8x8x32xbf16>
    %10 = vector.shape_cast %9 : vector<1x1x8x8x32xbf16> to vector<8x8x32xbf16>
    %11 = vector.shape_cast %10 : vector<8x8x32xbf16> to vector<64x32xbf16>
    %12 = tpu.concatenate %2, %5, %8, %11 in 1 : vector<64x32xbf16>, vector<64x32xbf16>, vector<64x32xbf16>, vector<64x32xbf16> -> vector<64x128xbf16>
    %c0_18 = arith.constant 0 : index
    %c0_19 = arith.constant 0 : index
    %13 = vector.load %arg3[%c0_18, %c0_19] : memref<128x16xbf16, #tpu.memory_space<vmem>>, vector<128x16xbf16>
    %cst = arith.constant dense<0.000000e+00> : vector<64x16xf32>
    %14 = tpu.matmul %12, %13, %cst {dimension_numbers = #tpu.dot_dimension_numbers<[1], [0], [0], [1], [0, 0, 1, 1], [], []>} : vector<64x128xbf16>, vector<128x16xbf16>, vector<64x16xf32> -> vector<64x16xf32>
    %15 = vector.shape_cast %14 : vector<64x16xf32> to vector<8x8x16xf32>
    %c0_20 = arith.constant 0 : index
    %c0_21 = arith.constant 0 : index
    %c0_22 = arith.constant 0 : index
    %c0_23 = arith.constant 0 : index
    %16 = vector.load %arg4[%c0_20, %c0_21, %c0_22, %c0_23] : memref<1x8x8x16xf32, #tpu.memory_space<vmem>>, vector<1x8x8x16xf32>
    %17 = vector.shape_cast %16 : vector<1x8x8x16xf32> to vector<8x8x16xf32>
    %18 = vector.shape_cast %15 : vector<8x8x16xf32> to vector<1x8x8x16xf32>
    tpu.vector_store %arg4[%c0_20, %c0_21, %c0_22, %c0_23], %18 {strides = array<i32>} : memref<1x8x8x16xf32, #tpu.memory_space<vmem>>, vector<1x8x8x16xf32>,
    %cst_24 = arith.constant dense<0.000000e+00> : vector<16xf32>
    %19 = vector.multi_reduction <add>, %14, %cst_24 [0] : vector<64x16xf32> to vector<16xf32>
    %20 = vector.shape_cast %19 : vector<16xf32> to vector<1x16xf32>
    %c0_25 = arith.constant 0 : index
    %c0_26 = arith.constant 0 : index
    %c0_27 = arith.constant 0 : index
    %c0_28 = arith.constant 0 : index
    %21 = vector.load %arg5[%c0_25, %c0_26, %c0_27, %c0_28] : memref<1x1x2x16xf32, #tpu.memory_space<vmem>>, vector<1x1x1x16xf32>
    %22 = vector.shape_cast %21 : vector<1x1x1x16xf32> to vector<1x16xf32>
    %23 = vector.shape_cast %20 : vector<1x16xf32> to vector<1x1x1x16xf32>
    tpu.vector_store %arg5[%c0_25, %c0_26, %c0_27, %c0_28], %23 {strides = array<i32>} : memref<1x1x2x16xf32, #tpu.memory_space<vmem>>, vector<1x1x1x16xf32>,
    %24 = arith.mulf %14, %14 : vector<64x16xf32>
    %cst_29 = arith.constant dense<0.000000e+00> : vector<16xf32>
    %25 = vector.multi_reduction <add>, %24, %cst_29 [0] : vector<64x16xf32> to vector<16xf32>
    %26 = vector.shape_cast %25 : vector<16xf32> to vector<1x16xf32>
    %c0_30 = arith.constant 0 : index
    %c0_31 = arith.constant 0 : index
    %c1_32 = arith.constant 1 : index
    %c0_33 = arith.constant 0 : index
    %27 = vector.load %arg5[%c0_30, %c0_31, %c1_32, %c0_33] : memref<1x1x2x16xf32, #tpu.memory_space<vmem>>, vector<1x1x1x16xf32>
    %28 = vector.shape_cast %27 : vector<1x1x1x16xf32> to vector<1x16xf32>
    %29 = vector.shape_cast %26 : vector<1x16xf32> to vector<1x1x1x16xf32>
    tpu.vector_store %arg5[%c0_30, %c0_31, %c1_32, %c0_33], %29 {strides = array<i32>} : memref<1x1x2x16xf32, #tpu.memory_space<vmem>>, vector<1x1x1x16xf32>,
    return
  }
  func.func @transform_0(%arg0: i32, %arg1: i32) -> (i32, i32, i32, i32, i32) {
    %c0_i32 = arith.constant 0 : i32
    %c0_i32_0 = arith.constant 0 : i32
    %c0_i32_1 = arith.constant 0 : i32
    %c0_i32_2 = arith.constant 0 : i32
    return %arg0, %arg1, %c0_i32, %c0_i32_0, %c0_i32_1 : i32, i32, i32, i32, i32
  }
  func.func @transform_1(%arg0: i32, %arg1: i32) -> (i32, i32) {
    %c0_i32 = arith.constant 0 : i32
    %c0_i32_0 = arith.constant 0 : i32
    %c0_i32_1 = arith.constant 0 : i32
    return %c0_i32, %c0_i32_0 : i32, i32
  }
  func.func @transform_2(%arg0: i32, %arg1: i32) -> (i32, i32, i32, i32) {
    %c0_i32 = arith.constant 0 : i32
    %c0_i32_0 = arith.constant 0 : i32
    %c0_i32_1 = arith.constant 0 : i32
    return %arg0, %arg1, %c0_i32, %c0_i32_0 : i32, i32, i32, i32
  }
  func.func @transform_3(%arg0: i32, %arg1: i32) -> (i32, i32, i32, i32) {
    %c0_i32 = arith.constant 0 : i32
    %c0_i32_0 = arith.constant 0 : i32
    %c0_i32_1 = arith.constant 0 : i32
    return %arg0, %arg1, %c0_i32, %c0_i32_0 : i32, i32, i32, i32
  }
}

module attributes {stable_mosaic.version = 11 : i64} {
  func.func @_bn_relu_kernel(%arg0: i32, %arg1: memref<128x16xf32, #tpu.memory_space<vmem>>, %arg2: memref<1x16xf32, #tpu.memory_space<vmem>>, %arg3: memref<1x16xf32, #tpu.memory_space<vmem>>, %arg4: memref<128x16xbf16, #tpu.memory_space<vmem>>) attributes {dimension_semantics = [#tpu.dimension_semantics<parallel>], iteration_bounds = array<i64: 1>, scalar_prefetch = 0 : i64, scratch_operands = 0 : i64, tpu.core_type = #tpu.core_type<tc>, window_params = [{transform_indices = @transform_0, window_bounds = array<i64: 128, 16>}, {pipeline_mode = #tpu.pipeline_mode<synchronous>, transform_indices = @transform_1, window_bounds = array<i64: 1, 16>}, {pipeline_mode = #tpu.pipeline_mode<synchronous>, transform_indices = @transform_2, window_bounds = array<i64: 1, 16>}, {transform_indices = @transform_3, window_bounds = array<i64: 128, 16>}]} {
    %c0 = arith.constant 0 : index
    %c0_0 = arith.constant 0 : index
    %0 = vector.load %arg1[%c0, %c0_0] : memref<128x16xf32, #tpu.memory_space<vmem>>, vector<128x16xf32>
    %c0_1 = arith.constant 0 : index
    %c0_2 = arith.constant 0 : index
    %1 = vector.load %arg2[%c0_1, %c0_2] : memref<1x16xf32, #tpu.memory_space<vmem>>, vector<1x16xf32>
    %2 = vector.broadcast %1 : vector<1x16xf32> to vector<128x16xf32>
    %3 = arith.mulf %0, %2 : vector<128x16xf32>
    %c0_3 = arith.constant 0 : index
    %c0_4 = arith.constant 0 : index
    %4 = vector.load %arg3[%c0_3, %c0_4] : memref<1x16xf32, #tpu.memory_space<vmem>>, vector<1x16xf32>
    %5 = vector.broadcast %4 : vector<1x16xf32> to vector<128x16xf32>
    %6 = arith.addf %3, %5 : vector<128x16xf32>
    %cst = arith.constant 0.000000e+00 : f32
    %7 = vector.broadcast %cst : f32 to vector<128x16xf32>
    %8 = arith.maximumf %6, %7 : vector<128x16xf32>
    %9 = arith.truncf %8 : vector<128x16xf32> to vector<128x16xbf16>
    %c0_5 = arith.constant 0 : index
    %c0_6 = arith.constant 0 : index
    %10 = vector.load %arg4[%c0_5, %c0_6] : memref<128x16xbf16, #tpu.memory_space<vmem>>, vector<128x16xbf16>
    tpu.vector_store %arg4[%c0_5, %c0_6], %9 {strides = array<i32>} : memref<128x16xbf16, #tpu.memory_space<vmem>>, vector<128x16xbf16>,
    return
  }
  func.func @transform_0(%arg0: i32) -> (i32, i32) {
    %c0_i32 = arith.constant 0 : i32
    %c0_i32_0 = arith.constant 0 : i32
    return %arg0, %c0_i32 : i32, i32
  }
  func.func @transform_1(%arg0: i32) -> (i32, i32) {
    %c0_i32 = arith.constant 0 : i32
    %c0_i32_0 = arith.constant 0 : i32
    %c0_i32_1 = arith.constant 0 : i32
    return %c0_i32, %c0_i32_0 : i32, i32
  }
  func.func @transform_2(%arg0: i32) -> (i32, i32) {
    %c0_i32 = arith.constant 0 : i32
    %c0_i32_0 = arith.constant 0 : i32
    %c0_i32_1 = arith.constant 0 : i32
    return %c0_i32, %c0_i32_0 : i32, i32
  }
  func.func @transform_3(%arg0: i32) -> (i32, i32) {
    %c0_i32 = arith.constant 0 : i32
    %c0_i32_0 = arith.constant 0 : i32
    return %arg0, %c0_i32 : i32, i32
  }
}

module attributes {stable_mosaic.version = 11 : i64} {
  func.func @_conv_stats_kernel(%arg0: i32, %arg1: i32, %arg2: memref<1x1x10x10x16xbf16, #tpu.memory_space<vmem>>, %arg3: memref<144x16xbf16, #tpu.memory_space<vmem>>, %arg4: memref<1x8x8x16xf32, #tpu.memory_space<vmem>>, %arg5: memref<1x1x2x16xf32, #tpu.memory_space<vmem>>) attributes {dimension_semantics = [#tpu.dimension_semantics<parallel>, #tpu.dimension_semantics<parallel>], iteration_bounds = array<i64: 2, 1>, scalar_prefetch = 0 : i64, scratch_operands = 0 : i64, tpu.core_type = #tpu.core_type<tc>, window_params = [{transform_indices = @transform_0, window_bounds = array<i64: 1, 1, 10, 10, 16>}, {pipeline_mode = #tpu.pipeline_mode<synchronous>, transform_indices = @transform_1, window_bounds = array<i64: 144, 16>}, {transform_indices = @transform_2, window_bounds = array<i64: 1, 8, 8, 16>}, {transform_indices = @transform_3, window_bounds = array<i64: 1, 1, 2, 16>}]} {
    %c0 = arith.constant 0 : index
    %c0_0 = arith.constant 0 : index
    %c0_1 = arith.constant 0 : index
    %c0_2 = arith.constant 0 : index
    %c0_3 = arith.constant 0 : index
    %0 = vector.load %arg2[%c0, %c0_0, %c0_1, %c0_2, %c0_3] : memref<1x1x10x10x16xbf16, #tpu.memory_space<vmem>>, vector<1x1x8x8x16xbf16>
    %1 = vector.shape_cast %0 : vector<1x1x8x8x16xbf16> to vector<8x8x16xbf16>
    %2 = vector.shape_cast %1 : vector<8x8x16xbf16> to vector<64x16xbf16>
    %c0_4 = arith.constant 0 : index
    %c0_5 = arith.constant 0 : index
    %c0_6 = arith.constant 0 : index
    %c1 = arith.constant 1 : index
    %c0_7 = arith.constant 0 : index
    %3 = vector.load %arg2[%c0_4, %c0_5, %c0_6, %c1, %c0_7] : memref<1x1x10x10x16xbf16, #tpu.memory_space<vmem>>, vector<1x1x8x8x16xbf16>
    %4 = vector.shape_cast %3 : vector<1x1x8x8x16xbf16> to vector<8x8x16xbf16>
    %5 = vector.shape_cast %4 : vector<8x8x16xbf16> to vector<64x16xbf16>
    %c0_8 = arith.constant 0 : index
    %c0_9 = arith.constant 0 : index
    %c0_10 = arith.constant 0 : index
    %c2 = arith.constant 2 : index
    %c0_11 = arith.constant 0 : index
    %6 = vector.load %arg2[%c0_8, %c0_9, %c0_10, %c2, %c0_11] : memref<1x1x10x10x16xbf16, #tpu.memory_space<vmem>>, vector<1x1x8x8x16xbf16>
    %7 = vector.shape_cast %6 : vector<1x1x8x8x16xbf16> to vector<8x8x16xbf16>
    %8 = vector.shape_cast %7 : vector<8x8x16xbf16> to vector<64x16xbf16>
    %c0_12 = arith.constant 0 : index
    %c0_13 = arith.constant 0 : index
    %c1_14 = arith.constant 1 : index
    %c0_15 = arith.constant 0 : index
    %c0_16 = arith.constant 0 : index
    %9 = vector.load %arg2[%c0_12, %c0_13, %c1_14, %c0_15, %c0_16] : memref<1x1x10x10x16xbf16, #tpu.memory_space<vmem>>, vector<1x1x8x8x16xbf16>
    %10 = vector.shape_cast %9 : vector<1x1x8x8x16xbf16> to vector<8x8x16xbf16>
    %11 = vector.shape_cast %10 : vector<8x8x16xbf16> to vector<64x16xbf16>
    %c0_17 = arith.constant 0 : index
    %c0_18 = arith.constant 0 : index
    %c1_19 = arith.constant 1 : index
    %c1_20 = arith.constant 1 : index
    %c0_21 = arith.constant 0 : index
    %12 = vector.load %arg2[%c0_17, %c0_18, %c1_19, %c1_20, %c0_21] : memref<1x1x10x10x16xbf16, #tpu.memory_space<vmem>>, vector<1x1x8x8x16xbf16>
    %13 = vector.shape_cast %12 : vector<1x1x8x8x16xbf16> to vector<8x8x16xbf16>
    %14 = vector.shape_cast %13 : vector<8x8x16xbf16> to vector<64x16xbf16>
    %c0_22 = arith.constant 0 : index
    %c0_23 = arith.constant 0 : index
    %c1_24 = arith.constant 1 : index
    %c2_25 = arith.constant 2 : index
    %c0_26 = arith.constant 0 : index
    %15 = vector.load %arg2[%c0_22, %c0_23, %c1_24, %c2_25, %c0_26] : memref<1x1x10x10x16xbf16, #tpu.memory_space<vmem>>, vector<1x1x8x8x16xbf16>
    %16 = vector.shape_cast %15 : vector<1x1x8x8x16xbf16> to vector<8x8x16xbf16>
    %17 = vector.shape_cast %16 : vector<8x8x16xbf16> to vector<64x16xbf16>
    %c0_27 = arith.constant 0 : index
    %c0_28 = arith.constant 0 : index
    %c2_29 = arith.constant 2 : index
    %c0_30 = arith.constant 0 : index
    %c0_31 = arith.constant 0 : index
    %18 = vector.load %arg2[%c0_27, %c0_28, %c2_29, %c0_30, %c0_31] : memref<1x1x10x10x16xbf16, #tpu.memory_space<vmem>>, vector<1x1x8x8x16xbf16>
    %19 = vector.shape_cast %18 : vector<1x1x8x8x16xbf16> to vector<8x8x16xbf16>
    %20 = vector.shape_cast %19 : vector<8x8x16xbf16> to vector<64x16xbf16>
    %c0_32 = arith.constant 0 : index
    %c0_33 = arith.constant 0 : index
    %c2_34 = arith.constant 2 : index
    %c1_35 = arith.constant 1 : index
    %c0_36 = arith.constant 0 : index
    %21 = vector.load %arg2[%c0_32, %c0_33, %c2_34, %c1_35, %c0_36] : memref<1x1x10x10x16xbf16, #tpu.memory_space<vmem>>, vector<1x1x8x8x16xbf16>
    %22 = vector.shape_cast %21 : vector<1x1x8x8x16xbf16> to vector<8x8x16xbf16>
    %23 = vector.shape_cast %22 : vector<8x8x16xbf16> to vector<64x16xbf16>
    %c0_37 = arith.constant 0 : index
    %c0_38 = arith.constant 0 : index
    %c2_39 = arith.constant 2 : index
    %c2_40 = arith.constant 2 : index
    %c0_41 = arith.constant 0 : index
    %24 = vector.load %arg2[%c0_37, %c0_38, %c2_39, %c2_40, %c0_41] : memref<1x1x10x10x16xbf16, #tpu.memory_space<vmem>>, vector<1x1x8x8x16xbf16>
    %25 = vector.shape_cast %24 : vector<1x1x8x8x16xbf16> to vector<8x8x16xbf16>
    %26 = vector.shape_cast %25 : vector<8x8x16xbf16> to vector<64x16xbf16>
    %27 = tpu.concatenate %2, %5, %8, %11, %14, %17, %20, %23, %26 in 1 : vector<64x16xbf16>, vector<64x16xbf16>, vector<64x16xbf16>, vector<64x16xbf16>, vector<64x16xbf16>, vector<64x16xbf16>, vector<64x16xbf16>, vector<64x16xbf16>, vector<64x16xbf16> -> vector<64x144xbf16>
    %c0_42 = arith.constant 0 : index
    %c0_43 = arith.constant 0 : index
    %28 = vector.load %arg3[%c0_42, %c0_43] : memref<144x16xbf16, #tpu.memory_space<vmem>>, vector<144x16xbf16>
    %cst = arith.constant dense<0.000000e+00> : vector<64x16xf32>
    %29 = tpu.matmul %27, %28, %cst {dimension_numbers = #tpu.dot_dimension_numbers<[1], [0], [0], [1], [0, 0, 1, 1], [], []>} : vector<64x144xbf16>, vector<144x16xbf16>, vector<64x16xf32> -> vector<64x16xf32>
    %30 = vector.shape_cast %29 : vector<64x16xf32> to vector<8x8x16xf32>
    %c0_44 = arith.constant 0 : index
    %c0_45 = arith.constant 0 : index
    %c0_46 = arith.constant 0 : index
    %c0_47 = arith.constant 0 : index
    %31 = vector.load %arg4[%c0_44, %c0_45, %c0_46, %c0_47] : memref<1x8x8x16xf32, #tpu.memory_space<vmem>>, vector<1x8x8x16xf32>
    %32 = vector.shape_cast %31 : vector<1x8x8x16xf32> to vector<8x8x16xf32>
    %33 = vector.shape_cast %30 : vector<8x8x16xf32> to vector<1x8x8x16xf32>
    tpu.vector_store %arg4[%c0_44, %c0_45, %c0_46, %c0_47], %33 {strides = array<i32>} : memref<1x8x8x16xf32, #tpu.memory_space<vmem>>, vector<1x8x8x16xf32>,
    %cst_48 = arith.constant dense<0.000000e+00> : vector<16xf32>
    %34 = vector.multi_reduction <add>, %29, %cst_48 [0] : vector<64x16xf32> to vector<16xf32>
    %35 = vector.shape_cast %34 : vector<16xf32> to vector<1x16xf32>
    %c0_49 = arith.constant 0 : index
    %c0_50 = arith.constant 0 : index
    %c0_51 = arith.constant 0 : index
    %c0_52 = arith.constant 0 : index
    %36 = vector.load %arg5[%c0_49, %c0_50, %c0_51, %c0_52] : memref<1x1x2x16xf32, #tpu.memory_space<vmem>>, vector<1x1x1x16xf32>
    %37 = vector.shape_cast %36 : vector<1x1x1x16xf32> to vector<1x16xf32>
    %38 = vector.shape_cast %35 : vector<1x16xf32> to vector<1x1x1x16xf32>
    tpu.vector_store %arg5[%c0_49, %c0_50, %c0_51, %c0_52], %38 {strides = array<i32>} : memref<1x1x2x16xf32, #tpu.memory_space<vmem>>, vector<1x1x1x16xf32>,
    %39 = arith.mulf %29, %29 : vector<64x16xf32>
    %cst_53 = arith.constant dense<0.000000e+00> : vector<16xf32>
    %40 = vector.multi_reduction <add>, %39, %cst_53 [0] : vector<64x16xf32> to vector<16xf32>
    %41 = vector.shape_cast %40 : vector<16xf32> to vector<1x16xf32>
    %c0_54 = arith.constant 0 : index
    %c0_55 = arith.constant 0 : index
    %c1_56 = arith.constant 1 : index
    %c0_57 = arith.constant 0 : index
    %42 = vector.load %arg5[%c0_54, %c0_55, %c1_56, %c0_57] : memref<1x1x2x16xf32, #tpu.memory_space<vmem>>, vector<1x1x1x16xf32>
    %43 = vector.shape_cast %42 : vector<1x1x1x16xf32> to vector<1x16xf32>
    %44 = vector.shape_cast %41 : vector<1x16xf32> to vector<1x1x1x16xf32>
    tpu.vector_store %arg5[%c0_54, %c0_55, %c1_56, %c0_57], %44 {strides = array<i32>} : memref<1x1x2x16xf32, #tpu.memory_space<vmem>>, vector<1x1x1x16xf32>,
    return
  }
  func.func @transform_0(%arg0: i32, %arg1: i32) -> (i32, i32, i32, i32, i32) {
    %c0_i32 = arith.constant 0 : i32
    %c0_i32_0 = arith.constant 0 : i32
    %c0_i32_1 = arith.constant 0 : i32
    %c0_i32_2 = arith.constant 0 : i32
    return %arg0, %arg1, %c0_i32, %c0_i32_0, %c0_i32_1 : i32, i32, i32, i32, i32
  }
  func.func @transform_1(%arg0: i32, %arg1: i32) -> (i32, i32) {
    %c0_i32 = arith.constant 0 : i32
    %c0_i32_0 = arith.constant 0 : i32
    %c0_i32_1 = arith.constant 0 : i32
    return %c0_i32, %c0_i32_0 : i32, i32
  }
  func.func @transform_2(%arg0: i32, %arg1: i32) -> (i32, i32, i32, i32) {
    %c0_i32 = arith.constant 0 : i32
    %c0_i32_0 = arith.constant 0 : i32
    %c0_i32_1 = arith.constant 0 : i32
    return %arg0, %arg1, %c0_i32, %c0_i32_0 : i32, i32, i32, i32
  }
  func.func @transform_3(%arg0: i32, %arg1: i32) -> (i32, i32, i32, i32) {
    %c0_i32 = arith.constant 0 : i32
    %c0_i32_0 = arith.constant 0 : i32
    %c0_i32_1 = arith.constant 0 : i32
    return %arg0, %arg1, %c0_i32, %c0_i32_0 : i32, i32, i32, i32
  }
}

module attributes {stable_mosaic.version = 11 : i64} {
  func.func @_bn_relu_kernel(%arg0: i32, %arg1: memref<128x16xf32, #tpu.memory_space<vmem>>, %arg2: memref<1x16xf32, #tpu.memory_space<vmem>>, %arg3: memref<1x16xf32, #tpu.memory_space<vmem>>, %arg4: memref<128x16xf32, #tpu.memory_space<vmem>>) attributes {dimension_semantics = [#tpu.dimension_semantics<parallel>], iteration_bounds = array<i64: 1>, scalar_prefetch = 0 : i64, scratch_operands = 0 : i64, tpu.core_type = #tpu.core_type<tc>, window_params = [{transform_indices = @transform_0, window_bounds = array<i64: 128, 16>}, {pipeline_mode = #tpu.pipeline_mode<synchronous>, transform_indices = @transform_1, window_bounds = array<i64: 1, 16>}, {pipeline_mode = #tpu.pipeline_mode<synchronous>, transform_indices = @transform_2, window_bounds = array<i64: 1, 16>}, {transform_indices = @transform_3, window_bounds = array<i64: 128, 16>}]} {
    %c0 = arith.constant 0 : index
    %c0_0 = arith.constant 0 : index
    %0 = vector.load %arg1[%c0, %c0_0] : memref<128x16xf32, #tpu.memory_space<vmem>>, vector<128x16xf32>
    %c0_1 = arith.constant 0 : index
    %c0_2 = arith.constant 0 : index
    %1 = vector.load %arg2[%c0_1, %c0_2] : memref<1x16xf32, #tpu.memory_space<vmem>>, vector<1x16xf32>
    %2 = vector.broadcast %1 : vector<1x16xf32> to vector<128x16xf32>
    %3 = arith.mulf %0, %2 : vector<128x16xf32>
    %c0_3 = arith.constant 0 : index
    %c0_4 = arith.constant 0 : index
    %4 = vector.load %arg3[%c0_3, %c0_4] : memref<1x16xf32, #tpu.memory_space<vmem>>, vector<1x16xf32>
    %5 = vector.broadcast %4 : vector<1x16xf32> to vector<128x16xf32>
    %6 = arith.addf %3, %5 : vector<128x16xf32>
    %cst = arith.constant 0.000000e+00 : f32
    %7 = vector.broadcast %cst : f32 to vector<128x16xf32>
    %8 = arith.maximumf %6, %7 : vector<128x16xf32>
    %c0_5 = arith.constant 0 : index
    %c0_6 = arith.constant 0 : index
    %9 = vector.load %arg4[%c0_5, %c0_6] : memref<128x16xf32, #tpu.memory_space<vmem>>, vector<128x16xf32>
    tpu.vector_store %arg4[%c0_5, %c0_6], %8 {strides = array<i32>} : memref<128x16xf32, #tpu.memory_space<vmem>>, vector<128x16xf32>,
    return
  }
  func.func @transform_0(%arg0: i32) -> (i32, i32) {
    %c0_i32 = arith.constant 0 : i32
    %c0_i32_0 = arith.constant 0 : i32
    return %arg0, %c0_i32 : i32, i32
  }
  func.func @transform_1(%arg0: i32) -> (i32, i32) {
    %c0_i32 = arith.constant 0 : i32
    %c0_i32_0 = arith.constant 0 : i32
    %c0_i32_1 = arith.constant 0 : i32
    return %c0_i32, %c0_i32_0 : i32, i32
  }
  func.func @transform_2(%arg0: i32) -> (i32, i32) {
    %c0_i32 = arith.constant 0 : i32
    %c0_i32_0 = arith.constant 0 : i32
    %c0_i32_1 = arith.constant 0 : i32
    return %c0_i32, %c0_i32_0 : i32, i32
  }
  func.func @transform_3(%arg0: i32) -> (i32, i32) {
    %c0_i32 = arith.constant 0 : i32
    %c0_i32_0 = arith.constant 0 : i32
    return %arg0, %c0_i32 : i32, i32
  }
}

</mosaic_0001>

<bundles_post_ra>
// kernel: down_forward.5
= control target key start
LH: loop header
LB: loop body
LE: loop exit
PB: predicated region body
PF: predicated region fallthrough
CT: control target
= control target key end

     0   :  { %vm156_vm0 = vcmask 125952   ;;  %s385_s0 = inlined_call_operand.vmem [shape: f32[128,16], index: 0, kind: input, shape index: {}]   ;;  %s386_s1 = inlined_call_operand.vmem [shape: f32[1,16], index: 1, kind: input, shape index: {}]   ;;  %s387_s2 = inlined_call_operand.vmem [shape: f32[1,16], index: 2, kind: input, shape index: {}]   ;;  %s388_s3 = inlined_call_operand.vmem [shape: bf16[128,16], index: 3, kind: output, shape index: {}]  }
   0x1   :  { %v14_v0 = vld [vmem:[%s385_s0] sm:$0xff]  ;;  %v15_v4 = vld [vmem:[%s385_s0 + $0x8] sm:$0xff]  ;;  %v16_v5 = vld [vmem:[%s385_s0 + $0x10] sm:$0xff] }
   0x2   :  { %v237_v1 = vld [vmem:[%s386_s1] ss:$0 sm:$0xff]  ;;  %v17_v6 = vld [vmem:[%s385_s0 + $0x18] sm:$0xff]  ;;  %v19_v11 = vld [vmem:[%s385_s0 + $0x28] sm:$0xff] }
   0x3   :  { %v242_v2 = vld [vmem:[%s387_s2] ss:$0 sm:$0xff]  ;;  %v37_v3 = vmul.f32 %v237_v1, %v14_v0  ;;  %v38_v7 = vmul.f32 %v237_v1, %v15_v4  ;;  %v39_v8 = vmul.f32 %v237_v1, %v16_v5  ;;  %v40_v9 = vmul.f32 %v237_v1, %v17_v6  ;;  %v20_v12 = vld [vmem:[%s385_s0 + $0x30] sm:$0xff]  ;;  %v21_v17 = vld [vmem:[%s385_s0 + $0x38] sm:$0xff] }
   0x4   :  { %v18_v10 = vld [vmem:[%s385_s0 + $0x20] sm:$0xff]  ;;  %v42_v15 = vmul.f32 %v237_v1, %v19_v11  ;;  %v43_v16 = vmul.f32 %v237_v1, %v20_v12  ;;  %v44_v21 = vmul.f32 %v237_v1, %v21_v17  ;;  %v23_v35 = vld [vmem:[%s385_s0 + $0x48] sm:$0xff]  ;;  %v24_v36 = vld [vmem:[%s385_s0 + $0x50] sm:$0xff] }
   0x5   :  { %v60_v13 = vadd.f32 %v242_v2, %v37_v3  ;;  %v41_v14 = vmul.f32 %v237_v1, %v18_v10  ;;  %v61_v18 = vadd.f32 %v242_v2, %v38_v7  ;;  %v62_v19 = vadd.f32 %v242_v2, %v39_v8  ;;  %v22_v30 = vld [vmem:[%s385_s0 + $0x40] sm:$0xff]  ;;  %v25_v37 = vld [vmem:[%s385_s0 + $0x58] sm:$0xff]  ;;  %v27_v43 = vld [vmem:[%s385_s0 + $0x68] sm:$0xff] }
   0x6   :  { %v63_v20 = vadd.f32 %v242_v2, %v40_v9  ;;  %v65_v24 = vadd.f32 %v242_v2, %v42_v15  ;;  %v66_v25 = vadd.f32 %v242_v2, %v43_v16  ;;  %v67_v29 = vadd.f32 %v242_v2, %v44_v21  ;;  %v26_v42 = vld [vmem:[%s385_s0 + $0x60] sm:$0xff]  ;;  %v28_v44 = vld [vmem:[%s385_s0 + $0x70] sm:$0xff]  ;;  %v29_v49 = vld [vmem:[%s385_s0 + $0x78] sm:$0xff] }
   0x7   :  { %v76_v22 = vmax.f32 %v60_v13, 0.0  ;;  %v64_v23 = vadd.f32 %v242_v2, %v41_v14  ;;  %v77_v26 = vmax.f32 %v61_v18, 0.0  ;;  %v78_v27 = vmax.f32 %v62_v19, 0.0 }
   0x8   :  { %v79_v28 = vmax.f32 %v63_v20, 0.0  ;;  %v81_v33 = vmax.f32 %v65_v24, 0.0  ;;  %v82_v34 = vmax.f32 %v66_v25, 0.0  ;;  %v83_v41 = vmax.f32 %v67_v29, 0.0 }
   0x9   :  { %v195_v31 = vpack.c.bf16 %v76_v22, %v76_v22  ;;  %v80_v32 = vmax.f32 %v64_v23, 0.0  ;;  %v196_v38 = vpack.c.bf16 %v77_v26, %v77_v26  ;;  %v197_v39 = vpack.c.bf16 %v78_v27, %v78_v27 }
   0xa   :  { %v198_v40 = vpack.c.bf16 %v79_v28, %v79_v28  ;;  %v200_v46 = vpack.c.bf16 %v81_v33, %v81_v33  ;;  %v201_v47 = vpack.c.bf16 %v82_v34, %v82_v34  ;;  %v45_v48 = vmul.f32 %v237_v1, %v22_v30 }
   0xb   :  { %157 = vst.msk [vmem:[%s388_s3] sm:$0xf] %vm156_vm0, %v195_v31  ;;  %v199_v45 = vpack.c.bf16 %v80_v32, %v80_v32  ;;  %158 = vst.msk [vmem:[%s388_s3 + $0x4] sm:$0xf] %vm156_vm0, %v196_v38  ;;  %v202_v50 = vpack.c.bf16 %v83_v41, %v83_v41  ;;  %v46_v51 = vmul.f32 %v237_v1, %v23_v35 }
   0xc   :  { %159 = vst.msk [vmem:[%s388_s3 + $0x8] sm:$0xf] %vm156_vm0, %v197_v39  ;;  %160 = vst.msk [vmem:[%s388_s3 + $0xc] sm:$0xf] %vm156_vm0, %v198_v40  ;;  %v47_v52 = vmul.f32 %v237_v1, %v24_v36  ;;  %v48_v53 = vmul.f32 %v237_v1, %v25_v37  ;;  %v68_v54 = vadd.f32 %v242_v2, %v45_v48 }
   0xd   :  { %161 = vst.msk [vmem:[%s388_s3 + $0x10] sm:$0xf] %vm156_vm0, %v199_v45  ;;  %162 = vst.msk [vmem:[%s388_s3 + $0x14] sm:$0xf] %vm156_vm0, %v200_v46  ;;  %v49_v55 = vmul.f32 %v237_v1, %v26_v42  ;;  %v50_v56 = vmul.f32 %v237_v1, %v27_v43  ;;  %v51_v57 = vmul.f32 %v237_v1, %v28_v44 }
   0xe   :  { %163 = vst.msk [vmem:[%s388_s3 + $0x18] sm:$0xf] %vm156_vm0, %v201_v47  ;;  %164 = vst.msk [vmem:[%s388_s3 + $0x1c] sm:$0xf] %vm156_vm0, %v202_v50  ;;  %v69_v58 = vadd.f32 %v242_v2, %v46_v51  ;;  %v70_v59 = vadd.f32 %v242_v2, %v47_v52  ;;  %v71_v60 = vadd.f32 %v242_v2, %v48_v53  ;;  %v84_v62 = vmax.f32 %v68_v54, 0.0 }
   0xf   :  { %v52_v61 = vmul.f32 %v237_v1, %v29_v49  ;;  %v72_v63 = vadd.f32 %v242_v2, %v49_v55  ;;  %v73_v0 = vadd.f32 %v242_v2, %v50_v56  ;;  %v74_v3 = vadd.f32 %v242_v2, %v51_v57 }
  0x10   :  { %v85_v4 = vmax.f32 %v69_v58, 0.0  ;;  %v86_v5 = vmax.f32 %v70_v59, 0.0  ;;  %v87_v6 = vmax.f32 %v71_v60, 0.0  ;;  %v203_v8 = vpack.c.bf16 %v84_v62, %v84_v62 }
  0x11   :  { %v75_v7 = vadd.f32 %v242_v2, %v52_v61  ;;  %v88_v9 = vmax.f32 %v72_v63, 0.0  ;;  %v89_v10 = vmax.f32 %v73_v0, 0.0  ;;  %v90_v11 = vmax.f32 %v74_v3, 0.0 }
  0x12   :  { %v204_v12 = vpack.c.bf16 %v85_v4, %v85_v4  ;;  %v205_v13 = vpack.c.bf16 %v86_v5, %v86_v5  ;;  %v206_v14 = vpack.c.bf16 %v87_v6, %v87_v6  ;;  %165 = vst.msk [vmem:[%s388_s3 + $0x20] sm:$0xf] %vm156_vm0, %v203_v8 }
  0x13   :  { %v91_v1 = vmax.f32 %v75_v7, 0.0  ;;  %v207_v15 = vpack.c.bf16 %v88_v9, %v88_v9  ;;  %v208_v16 = vpack.c.bf16 %v89_v10, %v89_v10  ;;  %v209_v17 = vpack.c.bf16 %v90_v11, %v90_v11 }
  0x14   :  { %166 = vst.msk [vmem:[%s388_s3 + $0x24] sm:$0xf] %vm156_vm0, %v204_v12  ;;  %167 = vst.msk [vmem:[%s388_s3 + $0x28] sm:$0xf] %vm156_vm0, %v205_v13 }
  0x15   :  { %168 = vst.msk [vmem:[%s388_s3 + $0x2c] sm:$0xf] %vm156_vm0, %v206_v14  ;;  %v210_v2 = vpack.c.bf16 %v91_v1, %v91_v1  ;;  %169 = vst.msk [vmem:[%s388_s3 + $0x30] sm:$0xf] %vm156_vm0, %v207_v15 }
  0x16   :  { %170 = vst.msk [vmem:[%s388_s3 + $0x34] sm:$0xf] %vm156_vm0, %v208_v16  ;;  %171 = vst.msk [vmem:[%s388_s3 + $0x38] sm:$0xf] %vm156_vm0, %v209_v17 }
  0x17   :  { %172 = vst.msk [vmem:[%s388_s3 + $0x3c] sm:$0xf] %vm156_vm0, %v210_v2 }

// kernel: down_forward.4
= control target key start
LH: loop header
LB: loop body
LE: loop exit
PB: predicated region body
PF: predicated region fallthrough
CT: control target
= control target key end

     0   :  { %s1128_s12 = smov 0   ;;  %s1130_s13 = smov 0   ;;  %s1399_s0 = inlined_call_operand.vmem [shape: bf16[2,1,9,9,32], index: 0, kind: input, shape index: {}]   ;;  %s1400_s1 = inlined_call_operand.vmem [shape: bf16[128,16], index: 1, kind: input, shape index: {}]   ;;  %s1401_s2 = inlined_call_operand.vmem [shape: f32[2,8,8,16], index: 2, kind: output, shape index: {0}]   ;;  %s1402_s3 = inlined_call_operand.vmem [shape: f32[2,1,2,16], index: 3, kind: output, shape index: {1}]  }
   0x1   :  { %s1132_s14 = smov 0  }
   0x2 LB: > { %s26_s15 = sadd.s32 1, %s1099_s13  ;;  %p937_p0 = scmp.ge.s32.totalorder %s1103_s14, 1  ;;  %s1103_s14 = sphi %s1132_s14, %s14_s14   ;;  %s1099_s13 = sphi %s1130_s13, %s1406_s13   ;;  %s1095_s12 = sphi %s1128_s12, %s1405_s12  }
   0x3   : > { %p28_p1 = scmp.ge.s32.totalorder %s26_s15, 2  ;;  %p162_p2 = scmp.lt.s32.totalorder %s1103_s14, 3 }
   0x5   : > { %s1408_s15 = smov (%p28_p1, %s26_s15), 0  ;;  %p163_p3 = pnand %p937_p0, %p162_p2 }
   0x6   : > { %p201_p4 = scmp.lt.s32.totalorder (!%p163_p3), %s1095_s12, 1  ;;  %s1105_s28 = smov (!%p163_p3), 64  }
   0x7   : > { %166 = sbr.rel (%p163_p3) target bundleno = 403 (0x193), region = 28  ;;  %s1106_s10 = smov (!%p163_p3), 96  }
   0x8   : > { %s1107_s11 = smov (!%p163_p3), 32  }
   0xc   : > { %s1410_s12 = smov (!%p201_p4, %s1095_s12), 1  ;;  %v1069_v0 = vld [vmem:[%s1400_s1 + $0x38] sm:$0xff]   ;;  %v1070_v1 = vld [vmem:[%s1400_s1 + $0x30] sm:$0xff]   ;;  %v1071_v2 = vld [vmem:[%s1400_s1 + $0x28] sm:$0xff]   ;;  %vm244_vm0 = vsmask.f32 3328 }
   0xd   : > { %s1037_s20 = smul.u32 72, %s1410_s12  ;;  %997 = vmatprep.subr.bf16.mxu0 %v1069_v0  ;;  %1021 = vmatprep.subr.bf16.mxu1 %v1069_v0  ;;  %v1072_v11 = vld [vmem:[%s1400_s1 + $0x20] sm:$0xff]   ;;  %vm245_vm1 = vsmask.f32 7440  ;;  %v1073_v30 = vld [vmem:[%s1400_s1 + $0x18] sm:$0xff]   ;;  %v1074_v62 = vld [vmem:[%s1400_s1 + $0x10] sm:$0xff]  }
   0xe   : > { %998 = vmatpush3.bf16.msra.mxu0 %v1069_v0  ;;  %1029 = vmatpush3.bf16.msra.mxu1 %v1069_v0  ;;  %vm1235_vm2 = vmor %vm244_vm0, %vm245_vm1  ;;  %vm576_vm3 = vcmask 261120   ;;  %vm589_vm4 = vcmask 523264   ;;  %vm598_vm5 = vcmask 785408   ;;  %s984_s16 = sshll.u32 %s1410_s12, 6  ;;  %vm740_vm6 = vcmask 130048  }
   0xf   : > { %s1158_s23 = scalar_lea.vmem %s1399_s0, %s1037_s20  ;;  %999 = vmatprep.subr.bf16.mxu0 %v1070_v1  ;;  %1022 = vmatprep.subr.bf16.mxu1 %v1070_v1  ;;  %s1352_s19 = scalar_lea.vmem %s1401_s2, %s984_s16  ;;  %vm770_vm7 = vcmask 122880  }
  0x10   : > { %v942_v3 = vld [vmem:[%s1158_s23 + $0x8] sm:$0xf]  ;;  %v943_v4 = vld [vmem:[%s1158_s23 + $0x10] sm:$0xf]  ;;  %v944_v5 = vld [vmem:[%s1158_s23 + $0x18] sm:$0xf] }
  0x11   : > { %v391_v6 = vshrl.u32 %v943_v4, 16  ;;  %v394_v7 = vshll.u32 %v943_v4, 16  ;;  %v966_v8 = vcombine.low %v942_v3, %v943_v4  ;;  %v377_v9 = vshrl.u32 %v942_v3, 16  ;;  %v945_v10 = vld [vmem:[%s1158_s23 + $0x20] sm:$0xf]  ;;  %s941_s20 = sshll.u32 %s1410_s12, 1 }
  0x12   : > { %v380_v12 = vshll.u32 %v942_v3, 16  ;;  %v405_v13 = vshrl.u32 %v944_v5, 16  ;;  %v408_v14 = vshll.u32 %v944_v5, 16  ;;  %v419_v15 = vshrl.u32 %v945_v10, 16  ;;  %v946_v16 = vld [vmem:[%s1158_s23 + $0x28] sm:$0xf]  ;;  %1000 = vmatpush3.bf16.msra.mxu0 %v1070_v1  ;;  %1030 = vmatpush3.bf16.msra.mxu1 %v1070_v1 }
  0x13   : > { %v393_v17 = vrot.slane %v391_v6, 4  ;;  %v396_v18 = vrot.slane %v394_v7, 5  ;;  %548 = vrot.lane.b32.xlu1 %v966_v8, %s1105_s28  ;;  %v379_v19 = vrot.slane %v377_v9, 4  ;;  %v422_v20 = vshll.u32 %v945_v10, 16  ;;  %v947_v21 = vld [vmem:[%s1158_s23 + $0x30] sm:$0xf]  ;;  %1001 = vmatprep.subr.bf16.mxu0 %v1071_v2 }
  0x14   : > { %v382_v22 = vrot.slane %v380_v12, 5  ;;  %v1173_v23 = vrot.slane %v405_v13, 4  ;;  %v1175_v24 = vrot.slane %v408_v14, 5  ;;  %v1177_v25 = vrot.slane %v419_v15, 4  ;;  %1023 = vmatprep.subr.bf16.mxu1 %v1071_v2  ;;  %v948_v35 = vld [vmem:[%s1158_s23 + $0x38] sm:$0xf] }
  0x15   : > { %v397_v26 = vor.u32 %v396_v18, %v393_v17  ;;  %v1179_v27 = vrot.slane %v422_v20, 5  ;;  %v967_v28 = vcombine.low %v944_v5, %v945_v10  ;;  %v447_v29 = vshrl.u32 %v947_v21, 16  ;;  %v949_v36 = vld [vmem:[%s1158_s23 + $0x40] sm:$0xf]  ;;  %v1196_v46 = vld [vmem:[%s1158_s23 + $0x8] sm:$0xf] }
  0x16   : > { %v383_v31 = vor.u32 %v382_v22, %v379_v19  ;;  %v450_v32 = vshll.u32 %v947_v21, 16  ;;  %v968_v33 = vcombine.low %v946_v16, %v947_v21  ;;  %v433_v34 = vshrl.u32 %v946_v16, 16  ;;  %1002 = vmatpush3.bf16.msra.mxu0 %v1071_v2  ;;  %1031 = vmatpush3.bf16.msra.mxu1 %v1071_v2  ;;  %v1190_v41 = vld [vmem:[%s1158_s23] sm:$0xf]  ;;  %v236_v51 = vld [vmem:[%s1158_s23 + $0x4] sm:$0x1] }
  0x17   : > { %v1186_v37 = vrot.slane %v397_v26, 4  ;;  %550 = vrot.lane.b32.xlu1 %v967_v28, %s1105_s28  ;;  %v449_v38 = vrot.slane %v447_v29, 4  ;;  %v436_v39 = vshll.u32 %v946_v16, 16  ;;  %v461_v40 = vshrl.u32 %v948_v35, 16  ;;  %1003 = vmatprep.subr.bf16.mxu0 %v1072_v11  ;;  %v237_v55 = vld [vmem:[%s1158_s23 + $0xc] sm:$0x1] }
  0x18   : > { %v1192_v42 = vrot.slane %v383_v31, 4  ;;  %v452_v43 = vrot.slane %v450_v32, 5  ;;  %552 = vrot.lane.b32.xlu0 %v968_v33, %s1105_s28  ;;  %v435_v44 = vrot.slane %v433_v34, 4  ;;  %v464_v45 = vshll.u32 %v948_v35, 16  ;;  %1024 = vmatprep.subr.bf16.mxu1 %v1072_v11  ;;  %v952_v61 = vld [vmem:[%s1158_s23 + $0x1c] sm:$0x1] }
  0x19   : > { %v438_v47 = vrot.slane %v436_v39, 5  ;;  %v1198_v48 = vrot.slane %v461_v40, 4  ;;  %v475_v49 = vshrl.u32 %v949_v36, 16  ;;  %v478_v50 = vshll.u32 %v949_v36, 16  ;;  %v953_v3 = vld [vmem:[%s1158_s23 + $0x24] sm:$0x1] }
  0x1a   : > { %v453_v52 = vor.u32 %v452_v43, %v449_v38  ;;  %v1201_v53 = vrot.slane %v464_v45, 5  ;;  %v969_v54 = vcombine.low %v948_v35, %v949_v36  ;;  %v248_v56 = vshrl.u32 %v1190_v41, 16  ;;  %1004 = vmatpush3.bf16.msra.mxu0 %v1072_v11  ;;  %1032 = vmatpush3.bf16.msra.mxu1 %v1072_v11  ;;  %v1223_v8 = vld [vmem:[%s1158_s23 + $0x10] sm:$0xf]  ;;  %v238_v17 = vld [vmem:[%s1158_s23 + $0x14] sm:$0x1] }
  0x1b   : > { %v439_v57 = vor.u32 %v438_v47, %v435_v44  ;;  %v1205_v58 = vrot.slane %v475_v49, 4  ;;  %v1207_v59 = vrot.slane %v478_v50, 5  ;;  %v251_v60 = vshll.u32 %v1190_v41, 16  ;;  %1005 = vmatprep.subr.bf16.mxu0 %v1073_v30  ;;  %1025 = vmatprep.subr.bf16.mxu1 %v1073_v30  ;;  %v1076_v18 = vld [vmem:[%s1400_s1 + $0x8] sm:$0xff]   ;;  %v239_v28 = vld [vmem:[%s1158_s23 + $0x1c] sm:$0x1] }
  0x1c   : > { %v1214_v63 = vrot.slane %v453_v52, 4  ;;  %554 = vrot.lane.b32.xlu1 %v969_v54, %s1105_s28  ;;  %v250_v0 = vrot.slane %v248_v56, 4  ;;  %v257_v1 = vshll.u32 %v236_v51, 16  ;;  %v262_v2 = vshrl.u32 %v1196_v46, 16  ;;  %v1248_v34 = vld [vmem:[%s1158_s23 + $0x30] sm:$0xf] }
  0x1d   : > { %v1219_v4 = vrot.slane %v439_v57, 4  ;;  %v253_v5 = vrot.slane %v251_v60, 5  ;;  %v265_v6 = vshll.u32 %v1196_v46, 16  ;;  %v271_v7 = vshll.u32 %v237_v55, 16  ;;  %v1254_v40 = vld [vmem:[%s1158_s23 + $0x38] sm:$0xf] }
  0x1e   : > { %v259_v9 = vrot.slane %v257_v1, 5  ;;  %v264_v10 = vrot.slane %v262_v2, 4  ;;  %v411_v11 = vor.u32 %v1175_v24, %v1173_v23  ;;  %v414_v12 = vshll.u32 %v952_v61, 16  ;;  %1006 = vmatpush3.bf16.msra.mxu0 %v1073_v30  ;;  %1033 = vmatpush3.bf16.msra.mxu1 %v1073_v30  ;;  %v1240_v23 = vld [vmem:[%s1158_s23 + $0x18] sm:$0xf]  ;;  %v1078_v43 = vld [vmem:[%s1400_s1] sm:$0xff]  }
  0x1f   : > { %v254_v13 = vor.u32 %v253_v5, %v250_v0  ;;  %v267_v14 = vrot.slane %v265_v6, 5  ;;  %v273_v15 = vrot.slane %v271_v7, 5  ;;  %v425_v16 = vor.u32 %v1179_v27, %v1177_v25  ;;  %1007 = vmatprep.subr.bf16.mxu0 %v1074_v62  ;;  %1026 = vmatprep.subr.bf16.mxu1 %v1074_v62  ;;  %v242_v50 = vld [vmem:[%s1158_s23 + $0x34] sm:$0x1]  ;;  %v243_v56 = vld [vmem:[%s1158_s23 + $0x3c] sm:$0x1] }
  0x20   : > { %v412_v20 = vrot.slane %v411_v11, 4  ;;  %v416_v21 = vrot.slane %v414_v12, 5  ;;  %v428_v22 = vshll.u32 %v953_v3, 16  ;;  %v276_v24 = vshrl.u32 %v1223_v8, 16  ;;  %v950_v0 = vld [vmem:[%s1158_s23 + $0xc] sm:$0x1] }
  0x21   : > { %v255_v25 = vrot.slane %v254_v13, 4  ;;  %v268_v26 = vor.u32 %v267_v14, %v264_v10  ;;  %v426_v27 = vrot.slane %v425_v16, 4  ;;  %v279_v29 = vshll.u32 %v1223_v8, 16  ;;  %v951_v6 = vld [vmem:[%s1158_s23 + $0x14] sm:$0x1] }
  0x22   : > { %v417_v30 = vsel %vm1235_vm2, %v412_v20, %v416_v21  ;;  %v430_v31 = vrot.slane %v428_v22, 5  ;;  %v278_v32 = vrot.slane %v276_v24, 4  ;;  %v285_v33 = vshll.u32 %v238_v17, 16  ;;  %1008 = vmatpush3.bf16.msra.mxu0 %v1074_v62  ;;  %1034 = vmatpush3.bf16.msra.mxu1 %v1074_v62  ;;  %v956_v12 = vld [vmem:[%s1158_s23 + $0x3c] sm:$0x1] }
  0x23   : > { %v260_v35 = vsel %vm1235_vm2, %v255_v25, %v259_v9  ;;  %v269_v36 = vrot.slane %v268_v26, 4  ;;  %v281_v38 = vrot.slane %v279_v29, 5  ;;  %v290_v39 = vshrl.u32 %v1240_v23, 16  ;;  %1009 = vmatprep.subr.bf16.mxu0 %v1076_v18  ;;  %1027 = vmatprep.subr.bf16.mxu1 %v1076_v18 }
  0x24   : > { %v431_v44 = vsel %vm1235_vm2, %v426_v27, %v430_v31  ;;  %v287_v45 = vrot.slane %v285_v33, 5  ;;  %v293_v47 = vshll.u32 %v1240_v23, 16  ;;  %v299_v49 = vshll.u32 %v239_v28, 16 }
  0x25   : > { %v274_v51 = vsel %vm1235_vm2, %v269_v36, %v273_v15  ;;  %v971_v52 = vcombine.low %v417_v30, %v431_v44  ;;  %v282_v54 = vor.u32 %v281_v38, %v278_v32  ;;  %v292_v55 = vrot.slane %v290_v39, 4  ;;  %v957_v30 = vld [vmem:[%s1158_s23 + $0x44] sm:$0x1]  ;;  %v1285_v32 = vld [vmem:[%s1158_s23 + $0x20] sm:$0xf] }
  0x26   : > { %v962_v57 = vcombine.low %v260_v35, %v274_v51  ;;  %v295_v60 = vrot.slane %v293_v47, 5  ;;  %v301_v61 = vrot.slane %v299_v49, 5  ;;  %v332_v62 = vshrl.u32 %v1248_v34, 16  ;;  %1010 = vmatpush3.bf16.msra.mxu0 %v1076_v18  ;;  %1035 = vmatpush3.bf16.msra.mxu1 %v1076_v18  ;;  %v240_v44 = vld [vmem:[%s1158_s23 + $0x24] sm:$0x1] }
  0x27   : > { %570 = vrot.lane.b32.xlu1 %v971_v52, %s1106_s10  ;;  %v283_v1 = vrot.slane %v282_v54, 4  ;;  %v335_v2 = vshll.u32 %v1248_v34, 16  ;;  %v341_v3 = vshll.u32 %v242_v50, 16  ;;  %v346_v5 = vshrl.u32 %v1254_v40, 16  ;;  %1011 = vmatprep.subr.bf16.mxu0 %v1078_v43  ;;  %v1298_v47 = vld [vmem:[%s1158_s23 + $0x28] sm:$0xf] }
  0x28   : > { %520 = vrot.lane.b32.xlu0 %v962_v57, %s1107_s11  ;;  %v296_v7 = vor.u32 %v295_v60, %v292_v55  ;;  %v334_v9 = vrot.slane %v332_v62, 4  ;;  %v349_v10 = vshll.u32 %v1254_v40, 16  ;;  %v355_v11 = vshll.u32 %v243_v56, 16  ;;  %1028 = vmatprep.subr.bf16.mxu1 %v1078_v43  ;;  %v241_v49 = vld [vmem:[%s1158_s23 + $0x2c] sm:$0x1] }
  0x29   : > { %v288_v13 = vsel %vm1235_vm2, %v283_v1, %v287_v45  ;;  %v337_v14 = vrot.slane %v335_v2, 5  ;;  %v343_v15 = vrot.slane %v341_v3, 5  ;;  %v348_v16 = vrot.slane %v346_v5, 4  ;;  %v954_v55 = vld [vmem:[%s1158_s23 + $0x2c] sm:$0x1] }
  0x2a   : > { %v297_v17 = vrot.slane %v296_v7, 4  ;;  %v351_v18 = vrot.slane %v349_v10, 5  ;;  %v357_v20 = vrot.slane %v355_v11, 5  ;;  %v386_v21 = vshll.u32 %v950_v0, 16  ;;  %1012 = vmatpush3.bf16.msra.mxu0 %v1078_v43  ;;  %1036 = vmatpush3.bf16.msra.mxu1 %v1078_v43  ;;  %v955_v56 = vld [vmem:[%s1158_s23 + $0x34] sm:$0x1]  ;;  %s226_s23 = scalar_lea.vmem %s1402_s3, %s941_s20 }
  0x2b   : > { %v338_v22 = vor.u32 %v337_v14, %v334_v9  ;;  %v400_v24 = vshll.u32 %v951_v6, 16  ;;  %v467_v25 = vor.u32 %v1201_v53, %v1198_v48  ;;  %v470_v26 = vshll.u32 %v956_v12, 16 }
  0x2c   : > { %v302_v27 = vsel %vm1235_vm2, %v297_v17, %v301_v61  ;;  %v352_v28 = vor.u32 %v351_v18, %v348_v16  ;;  %v388_v29 = vrot.slane %v386_v21, 5  ;;  %v481_v31 = vor.u32 %v1207_v59, %v1205_v58 }
  0x2d   : > { %v963_v33 = vcombine.low %v288_v13, %v302_v27  ;;  %v339_v35 = vrot.slane %v338_v22, 4  ;;  %v402_v36 = vrot.slane %v400_v24, 5  ;;  %v468_v38 = vrot.slane %v467_v25, 4 }
  0x2e   : > { %v353_v48 = vrot.slane %v352_v28, 4  ;;  %v389_v53 = vsel %vm1235_vm2, %v1192_v42, %v388_v29  ;;  %v472_v39 = vrot.slane %v470_v26, 5  ;;  %v482_v43 = vrot.slane %v481_v31, 4 }
  0x2f   : > { %522 = vrot.lane.b32.xlu0 %v963_v33, %s1107_s11  ;;  %v344_v58 = vsel %vm1235_vm2, %v339_v35, %v343_v15  ;;  %v403_v59 = vsel %vm1235_vm2, %v1186_v37, %v402_v36  ;;  %v484_v45 = vshll.u32 %v957_v30, 16  ;;  %v304_v50 = vshrl.u32 %v1285_v32, 16 }
  0x30   : > { %v358_v42 = vsel %vm1235_vm2, %v353_v48, %v357_v20  ;;  %v970_v51 = vcombine.low %v389_v53, %v403_v59  ;;  %v473_v52 = vsel %vm1235_vm2, %v468_v38, %v472_v39  ;;  %v307_v54 = vshll.u32 %v1285_v32, 16 }
  0x31   : > { %v965_v57 = vcombine.low %v344_v58, %v358_v42  ;;  %v486_v60 = vrot.slane %v484_v45, 5  ;;  %v306_v37 = vrot.slane %v304_v50, 4  ;;  %v313_v61 = vshll.u32 %v240_v44, 16 }
  0x32   : > { %v309_v62 = vrot.slane %v307_v54, 5  ;;  %v318_v0 = vshrl.u32 %v1298_v47, 16  ;;  %v321_v1 = vshll.u32 %v1298_v47, 16  ;;  %v327_v2 = vshll.u32 %v241_v49, 16 }
  0x33   : > { %526 = vrot.lane.b32.xlu1 %v965_v57, %s1107_s11  ;;  %568 = vrot.lane.b32.xlu0 %v970_v51, %s1106_s10  ;;  %v487_v3 = vsel %vm1235_vm2, %v482_v43, %v486_v60  ;;  %v315_v5 = vrot.slane %v313_v61, 5  ;;  %v442_v6 = vshll.u32 %v954_v55, 16  ;;  %v456_v7 = vshll.u32 %v955_v56, 16 }
  0x34   : > { %v973_v9 = vcombine.low %v473_v52, %v487_v3  ;;  %v310_v10 = vor.u32 %v309_v62, %v306_v37  ;;  %v320_v11 = vrot.slane %v318_v0, 4  ;;  %v323_v12 = vrot.slane %v321_v1, 5 }
  0x35   : > { %v329_v13 = vrot.slane %v327_v2, 5  ;;  %v444_v14 = vrot.slane %v442_v6, 5  ;;  %v458_v15 = vrot.slane %v456_v7, 5  ;;  %v958_v16 = vcombine.low %v1190_v41, %v1196_v46 }
  0x36   : > { %v311_v17 = vrot.slane %v310_v10, 4  ;;  %v324_v18 = vor.u32 %v323_v12, %v320_v11  ;;  %v959_v20 = vcombine.low %v1223_v8, %v1240_v23  ;;  %v961_v21 = vcombine.low %v1248_v34, %v1254_v40 }
  0x37   : > { %574 = vrot.lane.b32.xlu1 %v973_v9, %s1106_s10  ;;  %v960_v25 = vcombine.low %v1285_v32, %v1298_v47  ;;  %v445_v46 = vsel %vm1235_vm2, %v1219_v4, %v444_v14  ;;  %v459_v8 = vsel %vm1235_vm2, %v1214_v63, %v458_v15 }
  0x38   : > { %v316_v22 = vsel %vm1235_vm2, %v311_v17, %v315_v5  ;;  %v325_v24 = vrot.slane %v324_v18, 4  ;;  %v972_v34 = vcombine.low %v445_v46, %v459_v8 }
  0x3a   : > { %v330_v41 = vsel %vm1235_vm2, %v325_v24, %v329_v13 }
  0x3b   : > { %v964_v23 = vcombine.low %v316_v22, %v330_v41 }
  0x3d   : > { %524 = vrot.lane.b32.xlu0 %v964_v23, %s1107_s11 }
  0x41   : > { %572 = vrot.lane.b32.xlu0 %v972_v34, %s1106_s10 }
  0x85   : > { %v549_v40 = vpop.permute.xlu1 %548 }
  0x89   : > { %v551_v27 = vpop.permute.xlu1 %550 }
  0x8a   : > { %v553_v26 = vpop.permute.xlu0 %552 }
  0x8e   : > { %v555_v29 = vpop.permute.xlu1 %554 }
  0x99   : > { %v571_v33 = vpop.permute.xlu1 %570 }
  0x9a   : > { %v521_v28 = vpop.permute.xlu0 %520 }
  0x9b   : > { %v579_v31 = vsel %vm576_vm3, %v958_v16, %v521_v28 }
  0x9c   : > { %v591_v32 = vsel %vm589_vm4, %v579_v31, %v549_v40 }
  0xa1   : > { %v523_v30 = vpop.permute.xlu0 %522 }
  0xa2   : > { %v582_v4 = vsel %vm576_vm3, %v959_v20, %v523_v30 }
  0xa3   : > { %v593_v63 = vsel %vm589_vm4, %v582_v4, %v551_v27 }
  0xa4   : > { %v603_v36 = vsel %vm598_vm5, %v593_v63, %v571_v33 }
  0xa5   : > { %v569_v19 = vpop.permute.xlu0 %568  ;;  %v527_v38 = vpop.permute.xlu1 %526 }
  0xa6   : > { %v600_v35 = vsel %vm598_vm5, %v591_v32, %v569_v19  ;;  %v588_v39 = vsel %vm576_vm3, %v961_v21, %v527_v38 }
  0xa7   : > { %1013 = vmatprep.mubr.bf16.mxu0 %v600_v35  ;;  %v597_v45 = vsel %vm589_vm4, %v588_v39, %v555_v29 }
  0xa8   : > { %1014 = vmatmul.mubr.bf16.vlgmr.msra.gmra.mxu0 %v603_v36 }
  0xa9   : > { %v575_v43 = vpop.permute.xlu1 %574 }
  0xaa   : > { %v609_v47 = vsel %vm598_vm5, %v597_v45, %v575_v43 }
  0xaf   : > { %v525_v48 = vpop.permute.xlu0 %524 }
  0xb0   : > { %v585_v53 = vsel %vm576_vm3, %v960_v25, %v525_v48 }
  0xb1   : > { %v595_v58 = vsel %vm589_vm4, %v585_v53, %v553_v26 }
  0xb3   : > { %v573_v44 = vpop.permute.xlu0 %572 }
  0xb4   : > { %v606_v59 = vsel %vm598_vm5, %v595_v58, %v573_v44 }
  0xb5   : > { %1017 = vmatprep.mubr.bf16.mxu1 %v606_v59 }
  0xb6   : > { %1018 = vmatmul.mubr.bf16.vlgmr.msra.gmra.mxu1 %v609_v47 }
 0x168   : > { %v1015_v49 = vpop.f32.mrf.mxu0 }
 0x169   : > { %743 = vst.msk [vmem:[%s1352_s19 + $0x10] sm:$0xff] %vm740_vm6, %v1015_v49  ;;  %v774_v54 = vmul.f32 %v1015_v49, %v1015_v49  ;;  %v752_v37 = vsel %vm740_vm6, %v1015_v49, 0.0 }
 0x16a   : > { %v709_v50 = vpop.f32.mrf.mxu0 }
 0x16b   : > { %741 = vst.msk [vmem:[%s1352_s19] sm:$0xff] %vm740_vm6, %v709_v50  ;;  %v772_v51 = vmul.f32 %v709_v50, %v709_v50  ;;  %v749_v55 = vsel %vm740_vm6, %v709_v50, 0.0  ;;  %v783_v2 = vsel %vm740_vm6, %v774_v54, 0.0 }
 0x16c   : > { %v1016_v42 = vpop.f32.mrf.mxu0 }
 0x16d   : > { %744 = vst.msk [vmem:[%s1352_s19 + $0x18] sm:$0xff] %vm740_vm6, %v1016_v42  ;;  %v780_v61 = vsel %vm740_vm6, %v772_v51, 0.0  ;;  %v775_v3 = vmul.f32 %v1016_v42, %v1016_v42  ;;  %v754_v6 = vsel %vm740_vm6, %v1016_v42, 0.0 }
 0x16e   : > { %v712_v52 = vpop.f32.mrf.mxu0 }
 0x16f   : > { %742 = vst.msk [vmem:[%s1352_s19 + $0x8] sm:$0xff] %vm740_vm6, %v712_v52  ;;  %v750_v56 = vsel %vm740_vm6, %v712_v52, 0.0  ;;  %v773_v57 = vmul.f32 %v712_v52, %v712_v52  ;;  %v785_v10 = vsel %vm740_vm6, %v775_v3, 0.0 }
 0x170   : > { %v751_v60 = vadd.f32 %v750_v56, %v749_v55 }
 0x171   : > { %v781_v62 = vsel %vm740_vm6, %v773_v57, 0.0 }
 0x172   : > { %v753_v0 = vadd.f32 %v752_v37, %v751_v60  ;;  %v782_v1 = vadd.f32 %v781_v62, %v780_v61 }
 0x174   : > { %v784_v5 = vadd.f32 %v783_v2, %v782_v1  ;;  %v755_v9 = vadd.f32 %v754_v6, %v753_v0 }
 0x176   : > { %v1019_v7 = vpop.f32.mrf.mxu1  ;;  %v786_v12 = vadd.f32 %v785_v10, %v784_v5 }
 0x177   : > { %747 = vst.msk [vmem:[%s1352_s19 + $0x30] sm:$0xff] %vm740_vm6, %v1019_v7  ;;  %v778_v21 = vmul.f32 %v1019_v7, %v1019_v7  ;;  %v760_v41 = vsel %vm740_vm6, %v1019_v7, 0.0 }
 0x178   : > { %v725_v11 = vpop.f32.mrf.mxu1 }
 0x179   : > { %745 = vst.msk [vmem:[%s1352_s19 + $0x20] sm:$0xff] %vm740_vm6, %v725_v11  ;;  %v756_v13 = vsel %vm740_vm6, %v725_v11, 0.0  ;;  %v776_v14 = vmul.f32 %v725_v11, %v725_v11  ;;  %v791_v40 = vsel %vm740_vm6, %v778_v21, 0.0 }
 0x17a   : > { %v757_v15 = vadd.f32 %v756_v13, %v755_v9  ;;  %v1020_v16 = vpop.f32.mrf.mxu1 }
 0x17b   : > { %v787_v17 = vsel %vm740_vm6, %v776_v14, 0.0  ;;  %748 = vst.msk [vmem:[%s1352_s19 + $0x38] sm:$0xff] %vm740_vm6, %v1020_v16  ;;  %v779_v46 = vmul.f32 %v1020_v16, %v1020_v16  ;;  %v762_v26 = vsel %vm740_vm6, %v1020_v16, 0.0 }
 0x17c   : > { %v788_v18 = vadd.f32 %v787_v17, %v786_v12  ;;  %v728_v20 = vpop.f32.mrf.mxu1 }
 0x17d   : > { %746 = vst.msk [vmem:[%s1352_s19 + $0x28] sm:$0xff] %vm740_vm6, %v728_v20  ;;  %v758_v22 = vsel %vm740_vm6, %v728_v20, 0.0  ;;  %v777_v24 = vmul.f32 %v728_v20, %v728_v20  ;;  %v793_v29 = vsel %vm740_vm6, %v779_v46, 0.0 }
 0x17e   : > { %v759_v25 = vadd.f32 %v758_v22, %v757_v15 }
 0x17f   : > { %v789_v8 = vsel %vm740_vm6, %v777_v24, 0.0 }
 0x180   : > { %v761_v23 = vadd.f32 %v760_v41, %v759_v25  ;;  %v790_v34 = vadd.f32 %v789_v8, %v788_v18 }
 0x182   : > { %v763_v27 = vadd.f32 %v762_v26, %v761_v23  ;;  %v792_v28 = vadd.f32 %v791_v40, %v790_v34 }
 0x184   : > { %v764_v30 = vrot.slane %v763_v27, 4  ;;  %v794_v31 = vadd.f32 %v793_v29, %v792_v28 }
 0x186   : > { %v765_v4 = vadd.f32 %v764_v30, %v763_v27  ;;  %v795_v63 = vrot.slane %v794_v31, 4 }
 0x188   : > { %v766_v19 = vrot.slane %v765_v4, 2  ;;  %v796_v32 = vadd.f32 %v795_v63, %v794_v31 }
 0x18a   : > { %v767_v33 = vadd.f32 %v766_v19, %v765_v4  ;;  %v797_v35 = vrot.slane %v796_v32, 2 }
 0x18c   : > { %v768_v36 = vrot.slane %v767_v33, 1  ;;  %v798_v38 = vadd.f32 %v797_v35, %v796_v32 }
 0x18e   : > { %v769_v48 = vadd.f32 %v768_v36, %v767_v33  ;;  %v799_v53 = vrot.slane %v798_v38, 1 }
 0x190   : > { %771 = vst.msk [vmem:[%s226_s23] sm:$0x1] %vm770_vm7, %v769_v48  ;;  %v800_v39 = vadd.f32 %v799_v53, %v798_v38 }
 0x192   : > { %801 = vst.msk [vmem:[%s226_s23 + $0x1] sm:$0x1] %vm770_vm7, %v800_v39 }
 0x193 PF: > { %s14_s14 = sadd.s32 1, %s1103_s14   ;;  %s1405_s12 = smov %s1099_s13 }
 0x194   : > { %p11_p5 = scmp.ge.s32.totalorder %s14_s14, 4   ;;  %s1406_s13 = smov %s1408_s15 }
 0x196   :  { %13 = sbr.rel (!%p11_p5) target bundleno = 2 (0x2), region = 71 }

// kernel: down_forward.7
= control target key start
LH: loop header
LB: loop body
LE: loop exit
PB: predicated region body
PF: predicated region fallthrough
CT: control target
= control target key end

     0   :  { %vm93_vm0 = vcmask 130048   ;;  %s267_s0 = inlined_call_operand.vmem [shape: f32[128,16], index: 0, kind: input, shape index: {}]   ;;  %s268_s1 = inlined_call_operand.vmem [shape: f32[1,16], index: 1, kind: input, shape index: {}]   ;;  %s269_s2 = inlined_call_operand.vmem [shape: f32[1,16], index: 2, kind: input, shape index: {}]   ;;  %s270_s3 = inlined_call_operand.hbm [shape: f32[128,16], index: 3, kind: output, shape index: {}]  }
   0x1   :  { %v15_v0 = vld [vmem:[%s267_s0] sm:$0xff]  ;;  %v16_v4 = vld [vmem:[%s267_s0 + $0x8] sm:$0xff]  ;;  %v17_v5 = vld [vmem:[%s267_s0 + $0x10] sm:$0xff] }
   0x2   :  { %v126_v1 = vld [vmem:[%s268_s1] ss:$0 sm:$0xff]  ;;  %v18_v6 = vld [vmem:[%s267_s0 + $0x18] sm:$0xff]  ;;  %v20_v11 = vld [vmem:[%s267_s0 + $0x28] sm:$0xff] }
   0x3   :  { %v185_v2 = vld [vmem:[%s269_s2] ss:$0 sm:$0xff]  ;;  %v38_v3 = vmul.f32 %v126_v1, %v15_v0  ;;  %v39_v7 = vmul.f32 %v126_v1, %v16_v4  ;;  %v40_v8 = vmul.f32 %v126_v1, %v17_v5  ;;  %v41_v9 = vmul.f32 %v126_v1, %v18_v6  ;;  %v21_v12 = vld [vmem:[%s267_s0 + $0x30] sm:$0xff]  ;;  %v22_v17 = vld [vmem:[%s267_s0 + $0x38] sm:$0xff] }
   0x4   :  { %v19_v10 = vld [vmem:[%s267_s0 + $0x20] sm:$0xff]  ;;  %v43_v15 = vmul.f32 %v126_v1, %v20_v11  ;;  %v44_v16 = vmul.f32 %v126_v1, %v21_v12  ;;  %v45_v21 = vmul.f32 %v126_v1, %v22_v17  ;;  %v24_v23 = vld [vmem:[%s267_s0 + $0x48] sm:$0xff]  ;;  %v25_v24 = vld [vmem:[%s267_s0 + $0x50] sm:$0xff] }
   0x5   :  { %v61_v13 = vadd.f32 %v185_v2, %v38_v3  ;;  %v42_v14 = vmul.f32 %v126_v1, %v19_v10  ;;  %v62_v18 = vadd.f32 %v185_v2, %v39_v7  ;;  %v63_v19 = vadd.f32 %v185_v2, %v40_v8  ;;  %v23_v22 = vld [vmem:[%s267_s0 + $0x40] sm:$0xff]  ;;  %v26_v29 = vld [vmem:[%s267_s0 + $0x58] sm:$0xff]  ;;  %v28_v31 = vld [vmem:[%s267_s0 + $0x68] sm:$0xff] }
   0x6   :  { %v64_v20 = vadd.f32 %v185_v2, %v41_v9  ;;  %v66_v27 = vadd.f32 %v185_v2, %v43_v15  ;;  %v67_v28 = vadd.f32 %v185_v2, %v44_v16  ;;  %v27_v30 = vld [vmem:[%s267_s0 + $0x60] sm:$0xff]  ;;  %v68_v35 = vadd.f32 %v185_v2, %v45_v21  ;;  %v29_v36 = vld [vmem:[%s267_s0 + $0x70] sm:$0xff] }
   0x7   :  { %v77_v25 = vmax.f32 %v61_v13, 0.0  ;;  %v65_v26 = vadd.f32 %v185_v2, %v42_v14  ;;  %v78_v32 = vmax.f32 %v62_v18, 0.0  ;;  %v79_v33 = vmax.f32 %v63_v19, 0.0 }
   0x8   :  { %v80_v34 = vmax.f32 %v64_v20, 0.0 }
   0x9   :  { %8 = vsyncpa [#allocation3], 0  ;;  %94 = vst.msk [vmem:[#allocation2] sm:$0xff] %vm93_vm0, %v77_v25  ;;  %v81_v37 = vmax.f32 %v65_v26, 0.0  ;;  %v82_v38 = vmax.f32 %v66_v27, 0.0  ;;  %v83_v39 = vmax.f32 %v67_v28, 0.0  ;;  %v46_v40 = vmul.f32 %v126_v1, %v23_v22 }
   0xa   :  { %v30_v41 = vld [vmem:[%s267_s0 + $0x78] sm:$0xff]  ;;  %95 = vst.msk [vmem:[#allocation2 + $0x8] sm:$0xff] %vm93_vm0, %v78_v32  ;;  %96 = vst.msk [vmem:[#allocation2 + $0x10] sm:$0xff] %vm93_vm0, %v79_v33  ;;  %v84_v42 = vmax.f32 %v68_v35, 0.0  ;;  %v47_v43 = vmul.f32 %v126_v1, %v24_v23  ;;  %v48_v44 = vmul.f32 %v126_v1, %v25_v24  ;;  %v49_v45 = vmul.f32 %v126_v1, %v26_v29  ;;  %s153_s0 = smov [#allocation2]  }
   0xb   :  { %97 = vst.msk [vmem:[#allocation2 + $0x18] sm:$0xff] %vm93_vm0, %v80_v34  ;;  %98 = vst.msk [vmem:[#allocation2 + $0x20] sm:$0xff] %vm93_vm0, %v81_v37  ;;  %v69_v46 = vadd.f32 %v185_v2, %v46_v40  ;;  %v50_v47 = vmul.f32 %v126_v1, %v27_v30  ;;  %v51_v48 = vmul.f32 %v126_v1, %v28_v31  ;;  %s115_s19 = sshll.u32 %s153_s0, 4  ;;  %s116_s19 = int_to_ptr.vmem [resolvable:$true] %s115_s19 }
   0xc   :  { %99 = vst.msk [vmem:[#allocation2 + $0x28] sm:$0xff] %vm93_vm0, %v82_v38  ;;  %100 = vst.msk [vmem:[#allocation2 + $0x30] sm:$0xff] %vm93_vm0, %v83_v39  ;;  %v52_v49 = vmul.f32 %v126_v1, %v29_v36  ;;  %v70_v50 = vadd.f32 %v185_v2, %v47_v43  ;;  %v71_v51 = vadd.f32 %v185_v2, %v48_v44  ;;  %s131_s20 = scalar_lea.vmem %s116_s19, 2048  ;;  %p136_p1 = scmp.lt.s32.totalorder %s116_s19, %s116_s19 }
   0xd   :  { %101 = vst.msk [vmem:[#allocation2 + $0x38] sm:$0xff] %vm93_vm0, %v84_v42  ;;  %v72_v52 = vadd.f32 %v185_v2, %v49_v45  ;;  %v53_v53 = vmul.f32 %v126_v1, %v30_v41  ;;  %v85_v54 = vmax.f32 %v69_v46, 0.0  ;;  %v73_v55 = vadd.f32 %v185_v2, %v50_v47  ;;  %p132_p0 = scmp.ne.s32.totalorder %s116_s19, %s131_s20  ;;  %p137_p2 = scmp.lt.s32.totalorder %s131_s20, %s131_s20 }
   0xe   :  { %v74_v56 = vadd.f32 %v185_v2, %v51_v48  ;;  %v75_v57 = vadd.f32 %v185_v2, %v52_v49  ;;  %v86_v58 = vmax.f32 %v70_v50, 0.0  ;;  %v87_v59 = vmax.f32 %v71_v51, 0.0 }
   0xf   :  { %v88_v60 = vmax.f32 %v72_v52, 0.0  ;;  %v76_v61 = vadd.f32 %v185_v2, %v53_v53  ;;  %102 = vst.msk [vmem:[#allocation2 + $0x40] sm:$0xff] %vm93_vm0, %v85_v54  ;;  %v89_v62 = vmax.f32 %v73_v55, 0.0  ;;  %p138_p3 = por %p137_p2, %p136_p1 }
  0x10   :  { %v90_v63 = vmax.f32 %v74_v56, 0.0  ;;  %v91_v0 = vmax.f32 %v75_v57, 0.0  ;;  %103 = vst.msk [vmem:[#allocation2 + $0x48] sm:$0xff] %vm93_vm0, %v86_v58  ;;  %104 = vst.msk [vmem:[#allocation2 + $0x50] sm:$0xff] %vm93_vm0, %v87_v59 }
  0x11   :  { %105 = vst.msk [vmem:[#allocation2 + $0x58] sm:$0xff] %vm93_vm0, %v88_v60  ;;  %v92_v1 = vmax.f32 %v76_v61, 0.0  ;;  %106 = vst.msk [vmem:[#allocation2 + $0x60] sm:$0xff] %vm93_vm0, %v89_v62  ;;  %p139_p4 = pnand %p138_p3, %p132_p0 }
  0x12   :  { %107 = vst.msk [vmem:[#allocation2 + $0x68] sm:$0xff] %vm93_vm0, %v90_v63  ;;  %108 = vst.msk [vmem:[#allocation2 + $0x70] sm:$0xff] %vm93_vm0, %v91_v0 }
  0x13   :  { %109 = vst.msk [vmem:[#allocation2 + $0x78] sm:$0xff] %vm93_vm0, %v92_v1 }
  0x14   :  { %142 = shalt.err (!%p139_p4)
}
  0x15   :  { %s154_s21 = smov 128   ;;  %s155_s22 = smov 8  }
  0x16   :  { %121 = dma.vmem_to_hbm [thread:$0]  %s116_s19, 2048, %s270_s3, [#allocation3], %s154_s21, %s154_s21, %s155_s22  }
  0x17   :  { %151 = dma.done.wait [#allocation3], 2048  }
  0x18   :  { %152 = vsyncadd [#allocation3], 4294965248 }
  0x19   :  { %125 = vsyncpa [#allocation3], 1 }

// kernel: down_forward.6
= control target key start
LH: loop header
LB: loop body
LE: loop exit
PB: predicated region body
PF: predicated region fallthrough
CT: control target
= control target key end

     0   :  { %s1645_s12 = smov 0   ;;  %s1647_s13 = smov 0   ;;  %s2139_s0 = inlined_call_operand.vmem [shape: bf16[2,1,10,10,16], index: 0, kind: input, shape index: {}]   ;;  %s2140_s1 = inlined_call_operand.vmem [shape: bf16[144,16], index: 1, kind: input, shape index: {}]   ;;  %s2141_s2 = inlined_call_operand.vmem [shape: f32[2,8,8,16], index: 2, kind: output, shape index: {0}]   ;;  %s2142_s3 = inlined_call_operand.vmem [shape: f32[2,1,2,16], index: 3, kind: output, shape index: {1}]  }
   0x1   :  { %s1649_s14 = smov 0  }
   0x2 LB: > { %s26_s15 = sadd.s32 1, %s1611_s13  ;;  %p1392_p0 = scmp.ge.s32.totalorder %s1615_s14, 1  ;;  %s1615_s14 = sphi %s1649_s14, %s14_s14   ;;  %s1611_s13 = sphi %s1647_s13, %s2148_s13   ;;  %s1607_s12 = sphi %s1645_s12, %s2147_s12  }
   0x3   : > { %p28_p1 = scmp.ge.s32.totalorder %s26_s15, 2  ;;  %p162_p2 = scmp.lt.s32.totalorder %s1615_s14, 3 }
   0x5   : > { %s2150_s15 = smov (%p28_p1, %s26_s15), 0  ;;  %p163_p3 = pnand %p1392_p0, %p162_p2 }
   0x6   : > { %p201_p4 = scmp.lt.s32.totalorder (!%p163_p3), %s1607_s12, 1  ;;  %s1618_s28 = smov (!%p163_p3), 48  }
   0x7   : > { %166 = sbr.rel (%p163_p3) target bundleno = 427 (0x1ab), region = 28  ;;  %s1619_s4 = smov (!%p163_p3), 32  }
   0x8   : > { %s1620_s5 = smov (!%p163_p3), 96   ;;  %s1621_s8 = smov (!%p163_p3), 80  }
   0x9   : > { %s1622_s19 = smov (!%p163_p3), 64   ;;  %s1623_s20 = smov (!%p163_p3), 16  }
   0xa   : > { %s1624_s21 = smov (!%p163_p3), 112  }
   0xc   : > { %v1580_v0 = vld [vmem:[%s2140_s1 + $0x38] sm:$0xff]   ;;  %s2152_s12 = smov (!%p201_p4, %s1607_s12), 1  ;;  %v1617_v1 = vmov 0   ;;  %vm383_vm0 = vcmask 1042432   ;;  %v1581_v2 = vld [vmem:[%s2140_s1 + $0x30] sm:$0xff]   ;;  %vm384_vm1 = vcmask 1046532  }
   0xd   : > { %1131 = vmatprep.subr.bf16.mxu0 %v1617_v1  ;;  %1521 = vmatprep.subr.bf16.mxu1 %v1617_v1  ;;  %s1539_s18 = smul.u32 80, %s2152_s12  ;;  %v1582_v3 = vld [vmem:[%s2140_s1 + $0x28] sm:$0xff]   ;;  %v1583_v16 = vld [vmem:[%s2140_s1 + $0x20] sm:$0xff]   ;;  %vm1703_vm2 = vmor %vm383_vm0, %vm384_vm1  ;;  %vm244_vm3 = vsmask.f32 3328  ;;  %vm976_vm6 = vcmask 130048  }
   0xe   : > { %1132 = vmatpush1.bf16.msra.mxu0 %v1580_v0  ;;  %1530 = vmatpush1.bf16.msra.mxu1 %v1580_v0  ;;  %vm245_vm4 = vsmask.f32 7440  ;;  %v1584_v49 = vld [vmem:[%s2140_s1 + $0x18] sm:$0xff]   ;;  %vm989_vm7 = vcmask 261120   ;;  %vm998_vm8 = vcmask 392192   ;;  %vm1007_vm9 = vcmask 523264  }
   0xf   : > { %1133 = vmatprep.subr.bf16.mxu0 %v1617_v1  ;;  %1522 = vmatprep.subr.bf16.mxu1 %v1617_v1  ;;  %s1682_s25 = scalar_lea.vmem %s2139_s0, %s1539_s18  ;;  %vm1789_vm5 = vmor %vm244_vm3, %vm245_vm4  ;;  %vm1016_vm10 = vcmask 654336   ;;  %vm1025_vm11 = vcmask 785408   ;;  %vm1034_vm12 = vcmask 916480   ;;  %s1520_s22 = sshll.u32 %s2152_s12, 6  ;;  %vm1225_vm13 = vcmask 122880  }
  0x10   : > { %v1405_v4 = vld [vmem:[%s1682_s25 + $0x8] sm:$0xf]  ;;  %v1406_v5 = vld [vmem:[%s1682_s25 + $0x10] sm:$0xf]  ;;  %v1687_v6 = vld [vmem:[%s1682_s25 + $0x4] sm:$0x1] }
  0x11   : > { %v450_v7 = vshrl.u32 %v1406_v5, 16  ;;  %v453_v8 = vshll.u32 %v1406_v5, 16  ;;  %v1481_v9 = vcombine.low %v1405_v4, %v1406_v5  ;;  %v436_v10 = vshrl.u32 %v1405_v4, 16  ;;  %v1690_v11 = vld [vmem:[%s1682_s25 + $0xc] sm:$0x1]  ;;  %s1396_s26 = sshll.u32 %s2152_s12, 1 }
  0x12   : > { %1134 = vmatpush1.bf16.msra.mxu0 %v1581_v2  ;;  %1531 = vmatpush1.bf16.msra.mxu1 %v1581_v2  ;;  %v439_v12 = vshll.u32 %v1405_v4, 16  ;;  %v271_v13 = vshll.u32 %v1690_v11, 16  ;;  %v359_v14 = vld [vmem:[%s1682_s25] sm:$0xe]  ;;  %v360_v15 = vld [vmem:[%s1682_s25 + $0x8] sm:$0xe]  ;;  %s226_s29 = scalar_lea.vmem %s2142_s3, %s1396_s26 }
  0x13   : > { %1135 = vmatprep.subr.bf16.mxu0 %v1617_v1  ;;  %1523 = vmatprep.subr.bf16.mxu1 %v1617_v1  ;;  %v452_v17 = vrot.slane %v450_v7, 4  ;;  %v455_v18 = vrot.slane %v453_v8, 5  ;;  %v438_v19 = vrot.slane %v436_v10, 4  ;;  %v1397_v21 = vrot.slane %v359_v14, 9  ;;  %v1437_v22 = vld [vmem:[%s1682_s25 + $0x10] sm:$0xf] }
  0x14   : > { %868 = vrot.lane.b32.xlu1 %v1481_v9, %s1618_s28  ;;  %v441_v23 = vrot.slane %v439_v12, 5  ;;  %v388_v24 = vrot.slane %v1687_v6, 5  ;;  %v1398_v25 = vrot.slane %v360_v15, 9  ;;  %v392_v26 = vrot.slane %v1690_v11, 5  ;;  %v1438_v27 = vld [vmem:[%s1682_s25 + $0x18] sm:$0xf] }
  0x15   : > { %v456_v28 = vor.u32 %v455_v18, %v452_v17  ;;  %v257_v29 = vshll.u32 %v1687_v6, 16  ;;  %v621_v30 = vshrl.u32 %v1437_v22, 16  ;;  %v624_v31 = vshll.u32 %v1437_v22, 16  ;;  %v1713_v32 = vld [vmem:[%s1682_s25 + $0xc] sm:$0x1]  ;;  %v1585_v7 = vld [vmem:[%s2140_s1 + $0x10] sm:$0xff]  }
  0x16   : > { %1136 = vmatpush1.bf16.msra.mxu0 %v1582_v3  ;;  %1532 = vmatpush1.bf16.msra.mxu1 %v1582_v3  ;;  %v442_v33 = vor.u32 %v441_v23, %v438_v19  ;;  %v389_v34 = vsel %vm1703_vm2, %v1397_v21, %v388_v24  ;;  %v393_v35 = vsel %vm1703_vm2, %v1398_v25, %v392_v26  ;;  %v635_v36 = vshrl.u32 %v1438_v27, 16  ;;  %v1722_v37 = vld [vmem:[%s1682_s25 + $0x14] sm:$0x1]  ;;  %v1421_v38 = vld [vmem:[%s1682_s25 + $0x8] sm:$0xe] }
  0x17   : > { %1137 = vmatprep.subr.bf16.mxu0 %v1617_v1  ;;  %1524 = vmatprep.subr.bf16.mxu1 %v1617_v1  ;;  %v1725_v39 = vrot.slane %v456_v28, 4  ;;  %v1477_v40 = vcombine.low %v389_v34, %v393_v35  ;;  %v623_v41 = vrot.slane %v621_v30, 4  ;;  %v626_v42 = vrot.slane %v624_v31, 5  ;;  %v1422_v43 = vld [vmem:[%s1682_s25 + $0x10] sm:$0xe] }
  0x18   : > { %v1728_v44 = vrot.slane %v442_v33, 4  ;;  %v1730_v45 = vrot.slane %v635_v36, 4  ;;  %v638_v46 = vshll.u32 %v1438_v27, 16  ;;  %v1493_v47 = vcombine.low %v1437_v22, %v1438_v27  ;;  %v1733_v48 = vld [vmem:[%s1682_s25 + $0x14] sm:$0x1] }
  0x19   : > { %840 = vrot.lane.b32.xlu0 %v1477_v40, %s1619_s4  ;;  %v1429_v50 = vrot.slane %v1421_v38, 9  ;;  %v573_v51 = vrot.slane %v1713_v32, 5  ;;  %v1430_v52 = vrot.slane %v1422_v43, 9  ;;  %v577_v53 = vrot.slane %v1722_v37, 5  ;;  %v1742_v54 = vld [vmem:[%s1682_s25 + $0x1c] sm:$0x1] }
  0x1a   : > { %1138 = vmatpush1.bf16.msra.mxu0 %v1583_v16  ;;  %1533 = vmatpush1.bf16.msra.mxu1 %v1583_v16  ;;  %v640_v55 = vrot.slane %v638_v46, 5  ;;  %v361_v56 = vld [vmem:[%s1682_s25 + $0x10] sm:$0xe]  ;;  %v362_v57 = vld [vmem:[%s1682_s25 + $0x18] sm:$0xe]  ;;  %v396_v58 = vrot.slane %v1733_v48, 5  ;;  %v627_v59 = vor.u32 %v626_v42, %v623_v41 }
  0x1b   : > { %1139 = vmatprep.subr.bf16.mxu0 %v1617_v1  ;;  %936 = vrot.lane.b32.xlu1 %v1493_v47, %s1620_s5  ;;  %v574_v60 = vsel %vm1703_vm2, %v1429_v50, %v573_v51  ;;  %v578_v61 = vsel %vm1703_vm2, %v1430_v52, %v577_v53  ;;  %v1399_v62 = vrot.slane %v361_v56, 9  ;;  %v1400_v63 = vrot.slane %v362_v57, 9  ;;  %v1755_v0 = vld [vmem:[%s1682_s25] sm:$0xf]  ;;  %v1758_v2 = vld [vmem:[%s1682_s25 + $0x8] sm:$0xf] }
  0x1c   : > { %1525 = vmatprep.subr.bf16.mxu1 %v1617_v1  ;;  %v1489_v3 = vcombine.low %v574_v60, %v578_v61  ;;  %v400_v4 = vrot.slane %v1742_v54, 5  ;;  %v248_v5 = vshrl.u32 %v1755_v0, 16  ;;  %v251_v6 = vshll.u32 %v1755_v0, 16  ;;  %v1771_v14 = vld [vmem:[%s1682_s25 + $0x14] sm:$0x1]  ;;  %v1589_v61 = vld [vmem:[%s2140_s1 + $0x40] sm:$0xff]  }
  0x1d   : > { %v397_v8 = vsel %vm1703_vm2, %v1399_v62, %v396_v58  ;;  %v259_v9 = vrot.slane %v257_v29, 5  ;;  %v262_v10 = vshrl.u32 %v1758_v2, 16  ;;  %v265_v12 = vshll.u32 %v1758_v2, 16  ;;  %v1781_v19 = vld [vmem:[%s1682_s25 + $0x1c] sm:$0x1]  ;;  %v1586_v29 = vld [vmem:[%s2140_s1 + $0x8] sm:$0xff]  }
  0x1e   : > { %1140 = vmatpush1.bf16.msra.mxu0 %v1584_v49  ;;  %1534 = vmatpush1.bf16.msra.mxu1 %v1584_v49  ;;  %v401_v15 = vsel %vm1703_vm2, %v1400_v63, %v400_v4  ;;  %v250_v16 = vrot.slane %v248_v5, 4  ;;  %v253_v17 = vrot.slane %v251_v6, 5  ;;  %v273_v18 = vrot.slane %v271_v13, 5  ;;  %v1785_v25 = vld [vmem:[%s1682_s25 + $0x10] sm:$0xf] }
  0x1f   : > { %1141 = vmatprep.subr.bf16.mxu0 %v1617_v1  ;;  %1526 = vmatprep.subr.bf16.mxu1 %v1617_v1  ;;  %v1478_v21 = vcombine.low %v397_v8, %v401_v15  ;;  %v264_v22 = vrot.slane %v262_v10, 4  ;;  %v267_v23 = vrot.slane %v265_v12, 5  ;;  %v445_v24 = vshll.u32 %v1713_v32, 16  ;;  %v1808_v43 = vld [vmem:[%s1682_s25 + $0x18] sm:$0xf] }
  0x20   : > { %908 = vrot.lane.b32.xlu0 %v1489_v3, %s1621_s8  ;;  %v254_v27 = vor.u32 %v253_v17, %v250_v16  ;;  %v459_v28 = vshll.u32 %v1722_v37, 16  ;;  %v628_v11 = vrot.slane %v627_v59, 4  ;;  %v630_v13 = vshll.u32 %v1771_v14, 16  ;;  %v1818_v50 = vld [vmem:[%s1682_s25 + $0x20] sm:$0xf] }
  0x21   : > { %842 = vrot.lane.b32.xlu1 %v1478_v21, %s1619_s4  ;;  %v268_v30 = vor.u32 %v267_v23, %v264_v22  ;;  %v447_v31 = vrot.slane %v445_v24, 5  ;;  %v641_v32 = vor.u32 %v640_v55, %v1730_v45  ;;  %v644_v33 = vshll.u32 %v1781_v19, 16  ;;  %v1829_v55 = vld [vmem:[%s1682_s25 + $0x24] sm:$0x1]  ;;  %v1836_v60 = vld [vmem:[%s1682_s25 + $0x28] sm:$0xf] }
  0x22   : > { %1142 = vmatpush1.bf16.msra.mxu0 %v1585_v7  ;;  %1535 = vmatpush1.bf16.msra.mxu1 %v1585_v7  ;;  %v255_v34 = vrot.slane %v254_v27, 4  ;;  %v461_v35 = vrot.slane %v459_v28, 5  ;;  %v632_v36 = vrot.slane %v630_v13, 5  ;;  %v276_v37 = vshrl.u32 %v1785_v25, 16  ;;  %v1845_v4 = vld [vmem:[%s1682_s25 + $0x2c] sm:$0x1] }
  0x23   : > { %1143 = vmatprep.subr.bf16.mxu0 %v1617_v1  ;;  %1527 = vmatprep.subr.bf16.mxu1 %v1617_v1  ;;  %v269_v38 = vrot.slane %v268_v30, 4  ;;  %v448_v40 = vsel %vm1789_vm5, %v1728_v44, %v447_v31  ;;  %v642_v41 = vrot.slane %v641_v32, 4  ;;  %v646_v42 = vrot.slane %v644_v33, 5  ;;  %v1588_v44 = vld [vmem:[%s2140_s1] sm:$0xff]  }
  0x24   : > { %v260_v45 = vsel %vm1789_vm5, %v255_v34, %v259_v9  ;;  %v462_v46 = vsel %vm1789_vm5, %v1725_v39, %v461_v35  ;;  %v633_v47 = vsel %vm1789_vm5, %v628_v11, %v632_v36  ;;  %v278_v49 = vrot.slane %v276_v37, 4  ;;  %v1852_v9 = vld [vmem:[%s1682_s25 + $0x18] sm:$0xf]  ;;  %v1408_v27 = vld [vmem:[%s1682_s25 + $0x20] sm:$0xf] }
  0x25   : > { %v274_v51 = vsel %vm1789_vm5, %v269_v38, %v273_v18  ;;  %v1485_v52 = vcombine.low %v448_v40, %v462_v46  ;;  %v647_v39 = vsel %vm1789_vm5, %v642_v41, %v646_v42  ;;  %v279_v53 = vshll.u32 %v1785_v25, 16  ;;  %v363_v31 = vld [vmem:[%s1682_s25 + $0x20] sm:$0xe]  ;;  %v364_v40 = vld [vmem:[%s1682_s25 + $0x28] sm:$0xe] }
  0x26   : > { %1144 = vmatpush1.bf16.msra.mxu0 %v1586_v29  ;;  %1536 = vmatpush1.bf16.msra.mxu1 %v1586_v29  ;;  %v1473_v56 = vcombine.low %v260_v45, %v274_v51  ;;  %v1497_v57 = vcombine.low %v633_v47, %v647_v39  ;;  %v285_v58 = vshll.u32 %v1733_v48, 16  ;;  %v290_v59 = vshrl.u32 %v1808_v43, 16  ;;  %v1415_v47 = vld [vmem:[%s1682_s25 + $0x1c] sm:$0x1] }
  0x27   : > { %1145 = vmatprep.subr.bf16.mxu0 %v1617_v1  ;;  %1528 = vmatprep.subr.bf16.mxu1 %v1617_v1  ;;  %v281_v62 = vrot.slane %v279_v53, 5  ;;  %v293_v63 = vshll.u32 %v1808_v43, 16  ;;  %v299_v3 = vshll.u32 %v1742_v54, 16  ;;  %v304_v48 = vshrl.u32 %v1818_v50, 16 }
  0x28   : > { %888 = vrot.lane.b32.xlu1 %v1485_v52, %s1622_s19  ;;  %820 = vrot.lane.b32.xlu0 %v1473_v56, %s1623_s20  ;;  %v287_v5 = vrot.slane %v285_v58, 5  ;;  %v292_v6 = vrot.slane %v290_v59, 4  ;;  %v307_v7 = vshll.u32 %v1818_v50, 16  ;;  %v313_v8 = vshll.u32 %v1829_v55, 16 }
  0x29   : > { %v282_v10 = vor.u32 %v281_v62, %v278_v49  ;;  %v295_v12 = vrot.slane %v293_v63, 5  ;;  %v301_v54 = vrot.slane %v299_v3, 5  ;;  %v306_v15 = vrot.slane %v304_v48, 4  ;;  %v1416_v49 = vld [vmem:[%s1682_s25 + $0x24] sm:$0x1] }
  0x2a   : > { %1146 = vmatpush1.bf16.msra.mxu0 %v1588_v44  ;;  %1537 = vmatpush1.bf16.msra.mxu1 %v1588_v44  ;;  %v309_v16 = vrot.slane %v307_v7, 5  ;;  %v315_v17 = vrot.slane %v313_v8, 5  ;;  %v318_v18 = vshrl.u32 %v1836_v60, 16  ;;  %v321_v21 = vshll.u32 %v1836_v60, 16  ;;  %v1409_v3 = vld [vmem:[%s1682_s25 + $0x28] sm:$0xf] }
  0x2b   : > { %1161 = vmatprep.subr.bf16.mxu0 %v1617_v1  ;;  %1529 = vmatprep.subr.bf16.mxu1 %v1617_v1  ;;  %v283_v22 = vrot.slane %v282_v10, 4  ;;  %v296_v23 = vor.u32 %v295_v12, %v292_v6  ;;  %v327_v24 = vshll.u32 %v1845_v4, 16  ;;  %v464_v28 = vshrl.u32 %v1852_v9, 16  ;;  %v1410_v48 = vld [vmem:[%s1682_s25 + $0x30] sm:$0xf] }
  0x2c   : > { %956 = vrot.lane.b32.xlu0 %v1497_v57, %s1624_s21  ;;  %v310_v11 = vor.u32 %v309_v16, %v306_v15  ;;  %v320_v13 = vrot.slane %v318_v18, 4  ;;  %v323_v29 = vrot.slane %v321_v21, 5  ;;  %v467_v30 = vshll.u32 %v1852_v9, 16  ;;  %v1424_v18 = vld [vmem:[%s1682_s25 + $0x20] sm:$0xe] }
  0x2d   : > { %v288_v1 = vsel %vm1789_vm5, %v283_v22, %v287_v5  ;;  %v297_v32 = vrot.slane %v296_v23, 4  ;;  %v329_v33 = vrot.slane %v327_v24, 5  ;;  %v466_v34 = vrot.slane %v464_v28, 4  ;;  %v1418_v28 = vld [vmem:[%s1682_s25 + $0x34] sm:$0x1] }
  0x2e   : > { %1162 = vmatpush2.bf16.msra.mxu0 %v1589_v61  ;;  %1538 = vmatpush2.bf16.msra.mxu1 %v1589_v61  ;;  %v311_v35 = vrot.slane %v310_v11, 4  ;;  %v324_v36 = vor.u32 %v323_v29, %v320_v13  ;;  %v469_v37 = vrot.slane %v467_v30, 5  ;;  %v478_v38 = vshrl.u32 %v1408_v27, 16 }
  0x2f   : > { %v302_v41 = vsel %vm1789_vm5, %v297_v32, %v301_v54  ;;  %v481_v42 = vshll.u32 %v1408_v27, 16  ;;  %v1482_v45 = vcombine.low %v1852_v9, %v1408_v27  ;;  %v1401_v46 = vrot.slane %v363_v31, 9  ;;  %v1417_v27 = vld [vmem:[%s1682_s25 + $0x2c] sm:$0x1]  ;;  %v1439_v31 = vld [vmem:[%s1682_s25 + $0x20] sm:$0xf] }
  0x30   : > { %v1474_v44 = vcombine.low %v288_v1, %v302_v41  ;;  %v316_v51 = vsel %vm1789_vm5, %v311_v35, %v315_v17  ;;  %v325_v52 = vrot.slane %v324_v36, 4  ;;  %v480_v39 = vrot.slane %v478_v38, 4 }
  0x31   : > { %v483_v53 = vrot.slane %v481_v42, 5  ;;  %v404_v56 = vrot.slane %v1829_v55, 5  ;;  %v1402_v57 = vrot.slane %v364_v40, 9  ;;  %v408_v58 = vrot.slane %v1845_v4, 5  ;;  %v1423_v4 = vld [vmem:[%s1682_s25 + $0x18] sm:$0xe] }
  0x32   : > { %822 = vrot.lane.b32.xlu1 %v1474_v44, %s1623_s20  ;;  %v330_v59 = vsel %vm1789_vm5, %v325_v52, %v329_v33  ;;  %v470_v61 = vor.u32 %v469_v37, %v466_v34  ;;  %v473_v62 = vshll.u32 %v1415_v47, 16  ;;  %v487_v63 = vshll.u32 %v1416_v49, 16  ;;  %v1440_v42 = vld [vmem:[%s1682_s25 + $0x28] sm:$0xf] }
  0x33   : > { %v1475_v5 = vcombine.low %v316_v51, %v330_v59  ;;  %v405_v6 = vsel %vm1703_vm2, %v1401_v46, %v404_v56  ;;  %v409_v55 = vsel %vm1703_vm2, %v1402_v57, %v408_v58  ;;  %v484_v7 = vor.u32 %v483_v53, %v480_v39  ;;  %v1425_v44 = vld [vmem:[%s1682_s25 + $0x28] sm:$0xe]  ;;  %v1426_v39 = vld [vmem:[%s1682_s25 + $0x30] sm:$0xe] }
  0x34   : > { %v1479_v8 = vcombine.low %v405_v6, %v409_v55  ;;  %v471_v9 = vrot.slane %v470_v61, 4  ;;  %v475_v10 = vrot.slane %v473_v62, 5  ;;  %v489_v12 = vrot.slane %v487_v63, 5 }
  0x35   : > { %824 = vrot.lane.b32.xlu0 %v1475_v5, %s1623_s20  ;;  %v485_v54 = vrot.slane %v484_v7, 4  ;;  %v492_v15 = vshrl.u32 %v1409_v3, 16  ;;  %v495_v16 = vshll.u32 %v1409_v3, 16  ;;  %v506_v17 = vshrl.u32 %v1410_v48, 16 }
  0x36   : > { %870 = vrot.lane.b32.xlu1 %v1482_v45, %s1618_s28  ;;  %v476_v21 = vsel %vm1789_vm5, %v471_v9, %v475_v10  ;;  %v509_v22 = vshll.u32 %v1410_v48, 16  ;;  %v1483_v23 = vcombine.low %v1409_v3, %v1410_v48  ;;  %v1431_v24 = vrot.slane %v1423_v4, 9  ;;  %v1909_v3 = vld [vmem:[%s1682_s25 + $0x24] sm:$0x1]  ;;  %v1912_v48 = vld [vmem:[%s1682_s25 + $0x2c] sm:$0x1] }
  0x37   : > { %v490_v11 = vsel %vm1789_vm5, %v485_v54, %v489_v12  ;;  %v494_v13 = vrot.slane %v492_v15, 4  ;;  %v497_v29 = vrot.slane %v495_v16, 5  ;;  %v508_v30 = vrot.slane %v506_v17, 4  ;;  %v1441_v4 = vld [vmem:[%s1682_s25 + $0x30] sm:$0xf] }
  0x38   : > { %v1486_v1 = vcombine.low %v476_v21, %v490_v11  ;;  %v511_v32 = vrot.slane %v509_v22, 5  ;;  %v581_v33 = vrot.slane %v1415_v47, 5  ;;  %v1432_v34 = vrot.slane %v1424_v18, 9  ;;  %v1920_v15 = vld [vmem:[%s1682_s25 + $0x34] sm:$0x1] }
  0x39   : > { %844 = vrot.lane.b32.xlu0 %v1479_v8, %s1619_s4  ;;  %v585_v35 = vrot.slane %v1416_v49, 5  ;;  %v498_v36 = vor.u32 %v497_v29, %v494_v13  ;;  %v501_v37 = vshll.u32 %v1417_v27, 16  ;;  %v515_v38 = vshll.u32 %v1418_v28, 16  ;;  %v1442_v8 = vld [vmem:[%s1682_s25 + $0x38] sm:$0xf] }
  0x3a   : > { %890 = vrot.lane.b32.xlu1 %v1486_v1, %s1622_s19  ;;  %v582_v40 = vsel %vm1703_vm2, %v1431_v24, %v581_v33  ;;  %v512_v41 = vor.u32 %v511_v32, %v508_v30  ;;  %v649_v45 = vshrl.u32 %v1439_v31, 16  ;;  %v652_v46 = vshll.u32 %v1439_v31, 16  ;;  %v1930_v24 = vld [vmem:[%s1682_s25 + $0x3c] sm:$0x1] }
  0x3b   : > { %v586_v47 = vsel %vm1703_vm2, %v1432_v34, %v585_v35  ;;  %v499_v51 = vrot.slane %v498_v36, 4  ;;  %v503_v49 = vrot.slane %v501_v37, 5  ;;  %v517_v52 = vrot.slane %v515_v38, 5  ;;  %v1937_v36 = vld [vmem:[%s1682_s25 + $0x30] sm:$0xf] }
  0x3c   : > { %v1490_v53 = vcombine.low %v582_v40, %v586_v47  ;;  %v513_v56 = vrot.slane %v512_v41, 4  ;;  %v651_v57 = vrot.slane %v649_v45, 4  ;;  %v654_v58 = vrot.slane %v652_v46, 5  ;;  %v242_v37 = vld [vmem:[%s1682_s25 + $0x34] sm:$0x1] }
  0x3d   : > { %872 = vrot.lane.b32.xlu0 %v1483_v23, %s1618_s28  ;;  %v504_v59 = vsel %vm1789_vm5, %v499_v51, %v503_v49  ;;  %v663_v61 = vshrl.u32 %v1440_v42, 16  ;;  %v666_v62 = vshll.u32 %v1440_v42, 16  ;;  %v1494_v63 = vcombine.low %v1439_v31, %v1440_v42  ;;  %v1944_v45 = vld [vmem:[%s1682_s25 + $0x38] sm:$0xf] }
  0x3e   : > { %910 = vrot.lane.b32.xlu1 %v1490_v53, %s1621_s8  ;;  %v518_v5 = vsel %vm1789_vm5, %v513_v56, %v517_v52  ;;  %v1433_v6 = vrot.slane %v1425_v44, 9  ;;  %v589_v55 = vrot.slane %v1417_v27, 5  ;;  %v1434_v7 = vrot.slane %v1426_v39, 9  ;;  %v243_v52 = vld [vmem:[%s1682_s25 + $0x3c] sm:$0x1] }
  0x3f   : > { %v1487_v9 = vcombine.low %v504_v59, %v518_v5  ;;  %v665_v10 = vrot.slane %v663_v61, 4  ;;  %v668_v12 = vrot.slane %v666_v62, 5  ;;  %v593_v54 = vrot.slane %v1418_v28, 5  ;;  %v365_v62 = vld [vmem:[%s1682_s25 + $0x30] sm:$0xe] }
  0x40   : > { %v590_v16 = vsel %vm1703_vm2, %v1433_v6, %v589_v55  ;;  %v655_v17 = vor.u32 %v654_v58, %v651_v57  ;;  %v658_v18 = vshll.u32 %v1909_v3, 16  ;;  %v672_v21 = vshll.u32 %v1912_v48, 16 }
  0x41   : > { %892 = vrot.lane.b32.xlu0 %v1487_v9, %s1622_s19  ;;  %v594_v22 = vsel %vm1703_vm2, %v1434_v7, %v593_v54  ;;  %v669_v23 = vor.u32 %v668_v12, %v665_v10  ;;  %v677_v30 = vshrl.u32 %v1441_v4, 16  ;;  %v680_v31 = vshll.u32 %v1441_v4, 16  ;;  %v366_v7 = vld [vmem:[%s1682_s25 + $0x38] sm:$0xe] }
  0x42   : > { %938 = vrot.lane.b32.xlu1 %v1494_v63, %s1620_s5  ;;  %v1491_v27 = vcombine.low %v590_v16, %v594_v22  ;;  %v656_v28 = vrot.slane %v655_v17, 4  ;;  %v660_v11 = vrot.slane %v658_v18, 5  ;;  %v674_v13 = vrot.slane %v672_v21, 5  ;;  %v1411_v18 = vld [vmem:[%s1682_s25 + $0x38] sm:$0xf] }
  0x43   : > { %v670_v29 = vrot.slane %v669_v23, 4  ;;  %v691_v1 = vshrl.u32 %v1442_v8, 16  ;;  %v694_v33 = vshll.u32 %v1442_v8, 16  ;;  %v1495_v34 = vcombine.low %v1441_v4, %v1442_v8  ;;  %v1412_v21 = vld [vmem:[%s1682_s25 + $0x40] sm:$0xf] }
  0x44   : > { %v661_v32 = vsel %vm1789_vm5, %v656_v28, %v660_v11  ;;  %v686_v35 = vshll.u32 %v1920_v15, 16  ;;  %v679_v40 = vrot.slane %v677_v30, 4  ;;  %v682_v41 = vrot.slane %v680_v31, 5 }
  0x45   : > { %912 = vrot.lane.b32.xlu0 %v1491_v27, %s1621_s8  ;;  %v675_v38 = vsel %vm1789_vm5, %v670_v29, %v674_v13  ;;  %v693_v42 = vrot.slane %v691_v1, 4  ;;  %v696_v44 = vrot.slane %v694_v33, 5  ;;  %v700_v51 = vshll.u32 %v1930_v24, 16 }
  0x46   : > { %v1498_v46 = vcombine.low %v661_v32, %v675_v38  ;;  %v688_v47 = vrot.slane %v686_v35, 5  ;;  %v683_v49 = vor.u32 %v682_v41, %v679_v40  ;;  %v332_v39 = vshrl.u32 %v1937_v36, 16  ;;  %v1420_v41 = vld [vmem:[%s1682_s25 + $0x44] sm:$0x1] }
  0x47   : > { %v335_v53 = vshll.u32 %v1937_v36, 16  ;;  %v341_v56 = vshll.u32 %v242_v37, 16  ;;  %v697_v57 = vor.u32 %v696_v44, %v693_v42  ;;  %v702_v58 = vrot.slane %v700_v51, 5  ;;  %v1427_v42 = vld [vmem:[%s1682_s25 + $0x38] sm:$0xe] }
  0x48   : > { %958 = vrot.lane.b32.xlu1 %v1498_v46, %s1624_s21  ;;  %v346_v59 = vshrl.u32 %v1944_v45, 16  ;;  %v349_v61 = vshll.u32 %v1944_v45, 16  ;;  %v684_v63 = vrot.slane %v683_v49, 4  ;;  %v334_v5 = vrot.slane %v332_v39, 4  ;;  %v1428_v49 = vld [vmem:[%s1682_s25 + $0x40] sm:$0xe] }
  0x49   : > { %940 = vrot.lane.b32.xlu0 %v1495_v34, %s1620_s5  ;;  %v337_v6 = vrot.slane %v335_v53, 5  ;;  %v343_v55 = vrot.slane %v341_v56, 5  ;;  %v698_v4 = vrot.slane %v697_v57, 4  ;;  %v355_v10 = vshll.u32 %v243_v52, 16  ;;  %v1419_v34 = vld [vmem:[%s1682_s25 + $0x3c] sm:$0x1] }
  0x4a   : > { %v348_v8 = vrot.slane %v346_v59, 4  ;;  %v351_v9 = vrot.slane %v349_v61, 5  ;;  %v689_v12 = vsel %vm1789_vm5, %v684_v63, %v688_v47  ;;  %v1403_v16 = vrot.slane %v365_v62, 9  ;;  %v1443_v57 = vld [vmem:[%s1682_s25 + $0x40] sm:$0xf] }
  0x4b   : > { %v338_v54 = vor.u32 %v337_v6, %v334_v5  ;;  %v412_v17 = vrot.slane %v242_v37, 5  ;;  %v703_v22 = vsel %vm1789_vm5, %v698_v4, %v702_v58  ;;  %v357_v27 = vrot.slane %v355_v10, 5  ;;  %v1444_v63 = vld [vmem:[%s1682_s25 + $0x48] sm:$0xf] }
  0x4c   : > { %v352_v23 = vor.u32 %v351_v9, %v348_v8  ;;  %v1404_v28 = vrot.slane %v366_v7, 9  ;;  %v1499_v11 = vcombine.low %v689_v12, %v703_v22  ;;  %v416_v30 = vrot.slane %v243_v52, 5  ;;  %v1982_v12 = vld [vmem:[%s1682_s25 + $0x44] sm:$0x1] }
  0x4d   : > { %v339_v13 = vrot.slane %v338_v54, 4  ;;  %v413_v29 = vsel %vm1703_vm2, %v1403_v16, %v412_v17  ;;  %v520_v1 = vshrl.u32 %v1411_v18, 16  ;;  %v523_v32 = vshll.u32 %v1411_v18, 16 }
  0x4e   : > { %v353_v31 = vrot.slane %v352_v23, 4  ;;  %v534_v33 = vshrl.u32 %v1412_v21, 16  ;;  %960 = vrot.lane.b32.xlu0 %v1499_v11, %s1624_s21  ;;  %v417_v37 = vsel %vm1703_vm2, %v1404_v28, %v416_v30  ;;  %v537_v38 = vshll.u32 %v1412_v21, 16 }
  0x4f   : > { %v344_v35 = vsel %vm1789_vm5, %v339_v13, %v343_v55  ;;  %v1484_v40 = vcombine.low %v1411_v18, %v1412_v21  ;;  %v1480_v44 = vcombine.low %v413_v29, %v417_v37  ;;  %v522_v47 = vrot.slane %v520_v1, 4  ;;  %v1987_v21 = vld [vmem:[%s1682_s25 + $0x4c] sm:$0x1] }
  0x50   : > { %v358_v46 = vsel %vm1789_vm5, %v353_v31, %v357_v27  ;;  %v525_v51 = vrot.slane %v523_v32, 5  ;;  %v536_v39 = vrot.slane %v534_v33, 4  ;;  %v539_v53 = vrot.slane %v537_v38, 5 }
  0x51   : > { %v1476_v52 = vcombine.low %v344_v35, %v358_v46  ;;  %v529_v56 = vshll.u32 %v1419_v34, 16  ;;  %v543_v59 = vshll.u32 %v1420_v41, 16  ;;  %v1435_v61 = vrot.slane %v1427_v42, 9  ;;  %v1453_v35 = vld [vmem:[%s1682_s25 + $0x10] sm:$0xe] }
  0x52   : > { %v526_v58 = vor.u32 %v525_v51, %v522_v47  ;;  %v597_v62 = vrot.slane %v1419_v34, 5  ;;  %846 = vrot.lane.b32.xlu0 %v1480_v44, %s1619_s4  ;;  %v540_v6 = vor.u32 %v539_v53, %v536_v39  ;;  %v1436_v55 = vrot.slane %v1428_v49, 9  ;;  %v1454_v42 = vld [vmem:[%s1682_s25 + $0x18] sm:$0xe]  ;;  %v1455_v51 = vld [vmem:[%s1682_s25 + $0x20] sm:$0xe] }
  0x53   : > { %826 = vrot.lane.b32.xlu1 %v1476_v52, %s1623_s20  ;;  %v531_v5 = vrot.slane %v529_v56, 5  ;;  %v601_v7 = vrot.slane %v1420_v41, 5  ;;  %v545_v8 = vrot.slane %v543_v59, 5  ;;  %v705_v10 = vshrl.u32 %v1443_v57, 16  ;;  %v1456_v56 = vld [vmem:[%s1682_s25 + $0x28] sm:$0xe] }
  0x54   : > { %v527_v4 = vrot.slane %v526_v58, 4  ;;  %v598_v9 = vsel %vm1703_vm2, %v1435_v61, %v597_v62  ;;  %v541_v54 = vrot.slane %v540_v6, 4  ;;  %v708_v17 = vshll.u32 %v1443_v57, 16  ;;  %v1457_v59 = vld [vmem:[%s1682_s25 + $0x30] sm:$0xe] }
  0x55   : > { %v602_v16 = vsel %vm1703_vm2, %v1436_v55, %v601_v7  ;;  %v719_v18 = vshrl.u32 %v1444_v63, 16  ;;  %v707_v23 = vrot.slane %v705_v10, 4  ;;  %v722_v27 = vshll.u32 %v1444_v63, 16  ;;  %v1459_v7 = vld [vmem:[%s1682_s25 + $0x40] sm:$0xe] }
  0x56   : > { %v532_v22 = vsel %vm1789_vm5, %v527_v4, %v531_v5  ;;  %v546_v28 = vsel %vm1789_vm5, %v541_v54, %v545_v8  ;;  %v1492_v11 = vcombine.low %v598_v9, %v602_v16  ;;  %v710_v13 = vrot.slane %v708_v17, 5  ;;  %v1458_v5 = vld [vmem:[%s1682_s25 + $0x38] sm:$0xe]  ;;  %v1460_v4 = vld [vmem:[%s1682_s25 + $0x48] sm:$0xe]  ;;  %s2092_s25 = scalar_lea.vmem %s2141_s2, %s1520_s22 }
  0x57   : > { %874 = vrot.lane.b32.xlu1 %v1484_v40, %s1618_s28  ;;  %v721_v29 = vrot.slane %v719_v18, 4  ;;  %v1488_v30 = vcombine.low %v532_v22, %v546_v28  ;;  %v724_v31 = vrot.slane %v722_v27, 5  ;;  %v714_v1 = vshll.u32 %v1982_v12, 16 }
  0x58   : > { %v728_v32 = vshll.u32 %v1987_v21, 16  ;;  %v711_v33 = vor.u32 %v710_v13, %v707_v23  ;;  %v1469_v34 = vcombine.low %v1755_v0, %v1758_v2  ;;  %v1496_v37 = vcombine.low %v1443_v57, %v1444_v63 }
  0x59   : > { %894 = vrot.lane.b32.xlu0 %v1488_v30, %s1622_s19  ;;  %v716_v38 = vrot.slane %v714_v1, 5  ;;  %v725_v40 = vor.u32 %v724_v31, %v721_v29  ;;  %v766_v46 = vrot.slane %v1909_v3, 5  ;;  %v770_v44 = vrot.slane %v1912_v48, 5 }
  0x5a   : > { %v730_v41 = vrot.slane %v728_v32, 5  ;;  %v712_v47 = vrot.slane %v711_v33, 4  ;;  %v782_v52 = vrot.slane %v1982_v12, 5  ;;  %v1470_v39 = vcombine.low %v1785_v25, %v1808_v43 }
  0x5b   : > { %914 = vrot.lane.b32.xlu1 %v1492_v11, %s1621_s8  ;;  %v726_v49 = vrot.slane %v725_v40, 4  ;;  %v1461_v53 = vrot.slane %v1453_v35, 9  ;;  %v758_v3 = vrot.slane %v1771_v14, 5  ;;  %v1462_v48 = vrot.slane %v1454_v42, 9 }
  0x5c   : > { %v717_v57 = vsel %vm1789_vm5, %v712_v47, %v716_v38  ;;  %v762_v58 = vrot.slane %v1781_v19, 5  ;;  %v786_v62 = vrot.slane %v1987_v21, 5  ;;  %v1471_v63 = vcombine.low %v1818_v50, %v1836_v60 }
  0x5d   : > { %942 = vrot.lane.b32.xlu0 %v1496_v37, %s1620_s5  ;;  %v731_v61 = vsel %vm1789_vm5, %v726_v49, %v730_v41  ;;  %v759_v14 = vsel %vm1703_vm2, %v1461_v53, %v758_v3  ;;  %v1463_v55 = vrot.slane %v1455_v51, 9  ;;  %v1464_v26 = vrot.slane %v1456_v56, 9 }
  0x5e   : > { %v1500_v6 = vcombine.low %v717_v57, %v731_v61  ;;  %v763_v19 = vsel %vm1703_vm2, %v1462_v48, %v762_v58  ;;  %v1465_v9 = vrot.slane %v1457_v59, 9  ;;  %v774_v10 = vrot.slane %v1920_v15, 5 }
  0x5f   : > { %v1501_v8 = vcombine.low %v759_v14, %v763_v19  ;;  %v767_v12 = vsel %vm1703_vm2, %v1463_v55, %v766_v46  ;;  %v1466_v54 = vrot.slane %v1458_v5, 9  ;;  %v778_v16 = vrot.slane %v1930_v24, 5 }
  0x60   : > { %962 = vrot.lane.b32.xlu1 %v1500_v6, %s1624_s21  ;;  %v1472_v17 = vcombine.low %v1937_v36, %v1944_v45  ;;  %v771_v18 = vsel %vm1703_vm2, %v1464_v26, %v770_v44  ;;  %v775_v21 = vsel %vm1703_vm2, %v1465_v9, %v774_v10  ;;  %v1467_v15 = vrot.slane %v1459_v7, 9 }
  0x61   : > { %1514 = vmatprep.mubr.msk.bf16.mxu0 %vm976_vm6, %v1501_v8  ;;  %v1468_v22 = vrot.slane %v1460_v4, 9  ;;  %v1502_v23 = vcombine.low %v767_v12, %v771_v18  ;;  %v779_v27 = vsel %vm1703_vm2, %v1466_v54, %v778_v16 }
  0x62   : > { %v1503_v28 = vcombine.low %v775_v21, %v779_v27  ;;  %v783_v24 = vsel %vm1703_vm2, %v1467_v15, %v782_v52 }
  0x63   : > { %v787_v11 = vsel %vm1703_vm2, %v1468_v22, %v786_v62 }
  0x64   : > { %v1504_v13 = vcombine.low %v783_v24, %v787_v11  ;;  %1516 = vmatprep.mubr.msk.bf16.mxu1 %vm976_vm6, %v1503_v28 }
  0x86   : > { %v869_v29 = vpop.permute.xlu1 %868 }
  0x8b   : > { %v841_v30 = vpop.permute.xlu0 %840 }
  0x8d   : > { %v937_v31 = vpop.permute.xlu1 %936 }
  0x92   : > { %v909_v1 = vpop.permute.xlu0 %908 }
  0x93   : > { %v843_v32 = vpop.permute.xlu1 %842 }
  0x9a   : > { %v821_v33 = vpop.permute.xlu0 %820  ;;  %v889_v37 = vpop.permute.xlu1 %888 }
  0x9b   : > { %v979_v35 = vsel %vm976_vm6, %v1469_v34, %v821_v33 }
  0x9c   : > { %v991_v20 = vsel %vm989_vm7, %v979_v35, %v841_v30 }
  0x9d   : > { %v1000_v38 = vsel %vm998_vm8, %v991_v20, %v869_v29 }
  0x9e   : > { %v1009_v40 = vsel %vm1007_vm9, %v1000_v38, %v889_v37  ;;  %v957_v42 = vpop.permute.xlu0 %956 }
  0x9f   : > { %v1018_v41 = vsel %vm1016_vm10, %v1009_v40, %v909_v1 }
  0xa0   : > { %v1027_v46 = vsel %vm1025_vm11, %v1018_v41, %v937_v31 }
  0xa1   : > { %v1036_v0 = vsel %vm1034_vm12, %v1027_v46, %v957_v42 }
  0xa2   : > { %1164 = vmatmul.mubr.bf16.vlgmr.msra.gmra.mxu0 %v1036_v0 }
  0xa3   : > { %1515 = vmatprep.mubr.msk.bf16.mxu0 %vm976_vm6, %v1502_v23 }
  0xa4   : > { %v823_v2 = vpop.permute.xlu1 %822 }
  0xa5   : > { %v982_v53 = vsel %vm976_vm6, %v1470_v39, %v823_v2 }
  0xa6   : > { %v993_v3 = vsel %vm989_vm7, %v982_v53, %v843_v32 }
  0xa7   : > { %v825_v34 = vpop.permute.xlu0 %824 }
  0xa8   : > { %v871_v44 = vpop.permute.xlu1 %870  ;;  %v985_v25 = vsel %vm976_vm6, %v1471_v63, %v825_v34 }
  0xa9   : > { %v1002_v48 = vsel %vm998_vm8, %v993_v3, %v871_v44 }
  0xab   : > { %v845_v47 = vpop.permute.xlu0 %844 }
  0xac   : > { %v891_v51 = vpop.permute.xlu1 %890  ;;  %v995_v43 = vsel %vm989_vm7, %v985_v25, %v845_v47 }
  0xad   : > { %v1011_v59 = vsel %vm1007_vm9, %v1002_v48, %v891_v51 }
  0xaf   : > { %v873_v49 = vpop.permute.xlu0 %872 }
  0xb0   : > { %v911_v52 = vpop.permute.xlu1 %910  ;;  %v1004_v39 = vsel %vm998_vm8, %v995_v43, %v873_v49 }
  0xb1   : > { %v1020_v61 = vsel %vm1016_vm10, %v1011_v59, %v911_v52 }
  0xb3   : > { %v893_v56 = vpop.permute.xlu0 %892 }
  0xb4   : > { %v939_v57 = vpop.permute.xlu1 %938  ;;  %v1013_v19 = vsel %vm1007_vm9, %v1004_v39, %v893_v56 }
  0xb5   : > { %v1029_v62 = vsel %vm1025_vm11, %v1020_v61, %v939_v57 }
  0xb7   : > { %v913_v58 = vpop.permute.xlu0 %912 }
  0xb8   : > { %v1022_v55 = vsel %vm1016_vm10, %v1013_v19, %v913_v58 }
  0xba   : > { %v959_v5 = vpop.permute.xlu1 %958 }
  0xbb   : > { %v1039_v6 = vsel %vm1034_vm12, %v1029_v62, %v959_v5  ;;  %v941_v14 = vpop.permute.xlu0 %940 }
  0xbc   : > { %1172 = vmatmul.mubr.bf16.gmra.mxu0 %v1039_v6  ;;  %v1031_v7 = vsel %vm1025_vm11, %v1022_v55, %v941_v14 }
  0xc0   : > { %v961_v4 = vpop.permute.xlu0 %960 }
  0xc1   : > { %v1042_v8 = vsel %vm1034_vm12, %v1031_v7, %v961_v4 }
  0xc2   : > { %1180 = vmatmul.mubr.bf16.vlgmr.msra.gmra.mxu1 %v1042_v8 }
  0xc3   : > { %1517 = vmatprep.mubr.msk.bf16.mxu1 %vm976_vm6, %v1504_v13 }
  0xc4   : > { %v847_v60 = vpop.permute.xlu0 %846 }
  0xc5   : > { %v827_v50 = vpop.permute.xlu1 %826 }
  0xc6   : > { %v988_v63 = vsel %vm976_vm6, %v1472_v17, %v827_v50 }
  0xc7   : > { %v997_v26 = vsel %vm989_vm7, %v988_v63, %v847_v60 }
  0xc9   : > { %v875_v9 = vpop.permute.xlu1 %874 }
  0xca   : > { %v1006_v10 = vsel %vm998_vm8, %v997_v26, %v875_v9 }
  0xcb   : > { %v895_v12 = vpop.permute.xlu0 %894 }
  0xcc   : > { %v1015_v54 = vsel %vm1007_vm9, %v1006_v10, %v895_v12 }
  0xcd   : > { %v915_v16 = vpop.permute.xlu1 %914 }
  0xce   : > { %v1024_v18 = vsel %vm1016_vm10, %v1015_v54, %v915_v16 }
  0xcf   : > { %v943_v21 = vpop.permute.xlu0 %942 }
  0xd0   : > { %v1033_v15 = vsel %vm1025_vm11, %v1024_v18, %v943_v21 }
  0xd2   : > { %v963_v22 = vpop.permute.xlu1 %962 }
  0xd3   : > { %v1045_v23 = vsel %vm1034_vm12, %v1033_v15, %v963_v22 }
  0xd4   : > { %1188 = vmatmul.mubr.bf16.gmra.mxu1 %v1045_v23 }
 0x162   : > { %v1165_v36 = vpop.f32.mrf.mxu0 }
 0x163   : > { %1196 = vst.msk [vmem:[%s2092_s25] sm:$0xff] %vm976_vm6, %v1165_v36  ;;  %v1227_v33 = vmul.f32 %v1165_v36, %v1165_v36  ;;  %v1204_v37 = vsel %vm976_vm6, %v1165_v36, 0.0 }
 0x164   : > { %v1167_v45 = vpop.f32.mrf.mxu0 }
 0x165   : > { %v1235_v46 = vsel %vm976_vm6, %v1227_v33, 0.0 }
 0x166   : > { %v1168_v17 = vpop.f32.mrf.mxu0 }
 0x167   : > { %1197 = vst.msk [vmem:[%s2092_s25 + $0x8] sm:$0xff] %vm976_vm6, %v1168_v17  ;;  %v1228_v1 = vmul.f32 %v1168_v17, %v1168_v17  ;;  %v1205_v35 = vsel %vm976_vm6, %v1168_v17, 0.0 }
 0x168   : > { %v1170_v27 = vpop.f32.mrf.mxu0  ;;  %v1206_v42 = vadd.f32 %v1205_v35, %v1204_v37 }
 0x169   : > { %v1236_v38 = vsel %vm976_vm6, %v1228_v1, 0.0 }
 0x16a   : > { %v1237_v34 = vadd.f32 %v1236_v38, %v1235_v46 }
 0x17c   : > { %v1173_v28 = vpop.f32.mrf.mxu0 }
 0x17d   : > { %1198 = vst.msk [vmem:[%s2092_s25 + $0x10] sm:$0xff] %vm976_vm6, %v1173_v28  ;;  %v1229_v20 = vmul.f32 %v1173_v28, %v1173_v28  ;;  %v1207_v40 = vsel %vm976_vm6, %v1173_v28, 0.0 }
 0x17e   : > { %v1175_v24 = vpop.f32.mrf.mxu0  ;;  %v1208_v44 = vadd.f32 %v1207_v40, %v1206_v42 }
 0x17f   : > { %v1238_v0 = vsel %vm976_vm6, %v1229_v20, 0.0 }
 0x180   : > { %v1176_v11 = vpop.f32.mrf.mxu0  ;;  %v1239_v49 = vadd.f32 %v1238_v0, %v1237_v34 }
 0x181   : > { %1199 = vst.msk [vmem:[%s2092_s25 + $0x18] sm:$0xff] %vm976_vm6, %v1176_v11  ;;  %v1230_v41 = vmul.f32 %v1176_v11, %v1176_v11  ;;  %v1209_v2 = vsel %vm976_vm6, %v1176_v11, 0.0 }
 0x182   : > { %v1178_v13 = vpop.f32.mrf.mxu0  ;;  %v1181_v29 = vpop.f32.mrf.mxu1  ;;  %v1210_v52 = vadd.f32 %v1209_v2, %v1208_v44 }
 0x183   : > { %1200 = vst.msk [vmem:[%s2092_s25 + $0x20] sm:$0xff] %vm976_vm6, %v1181_v29  ;;  %v1240_v47 = vsel %vm976_vm6, %v1230_v41, 0.0  ;;  %v1231_v51 = vmul.f32 %v1181_v29, %v1181_v29  ;;  %v1211_v53 = vsel %vm976_vm6, %v1181_v29, 0.0 }
 0x184   : > { %v1183_v30 = vpop.f32.mrf.mxu1  ;;  %v1241_v57 = vadd.f32 %v1240_v47, %v1239_v49  ;;  %v1212_v58 = vadd.f32 %v1211_v53, %v1210_v52 }
 0x185   : > { %v1242_v3 = vsel %vm976_vm6, %v1231_v51, 0.0 }
 0x186   : > { %v1184_v31 = vpop.f32.mrf.mxu1  ;;  %v1243_v6 = vadd.f32 %v1242_v3, %v1241_v57 }
 0x187   : > { %1201 = vst.msk [vmem:[%s2092_s25 + $0x28] sm:$0xff] %vm976_vm6, %v1184_v31  ;;  %v1232_v56 = vmul.f32 %v1184_v31, %v1184_v31  ;;  %v1213_v48 = vsel %vm976_vm6, %v1184_v31, 0.0 }
 0x188   : > { %v1186_v32 = vpop.f32.mrf.mxu1  ;;  %v1214_v14 = vadd.f32 %v1213_v48, %v1212_v58 }
 0x189   : > { %v1244_v61 = vsel %vm976_vm6, %v1232_v56, 0.0 }
 0x18a   : > { %v1245_v39 = vadd.f32 %v1244_v61, %v1243_v6 }
 0x194   : > { %v1189_v59 = vpop.f32.mrf.mxu1 }
 0x195   : > { %1202 = vst.msk [vmem:[%s2092_s25 + $0x30] sm:$0xff] %vm976_vm6, %v1189_v59  ;;  %v1215_v62 = vsel %vm976_vm6, %v1189_v59, 0.0  ;;  %v1233_v5 = vmul.f32 %v1189_v59, %v1189_v59 }
 0x196   : > { %v1191_v25 = vpop.f32.mrf.mxu1  ;;  %v1216_v19 = vadd.f32 %v1215_v62, %v1214_v14 }
 0x197   : > { %v1246_v43 = vsel %vm976_vm6, %v1233_v5, 0.0 }
 0x198   : > { %v1192_v55 = vpop.f32.mrf.mxu1  ;;  %v1247_v8 = vadd.f32 %v1246_v43, %v1245_v39 }
 0x199   : > { %1203 = vst.msk [vmem:[%s2092_s25 + $0x38] sm:$0xff] %vm976_vm6, %v1192_v55  ;;  %v1217_v7 = vsel %vm976_vm6, %v1192_v55, 0.0  ;;  %v1234_v4 = vmul.f32 %v1192_v55, %v1192_v55 }
 0x19a   : > { %v1218_v50 = vadd.f32 %v1217_v7, %v1216_v19  ;;  %v1194_v60 = vpop.f32.mrf.mxu1 }
 0x19b   : > { %v1248_v63 = vsel %vm976_vm6, %v1234_v4, 0.0 }
 0x19c   : > { %v1219_v26 = vrot.slane %v1218_v50, 4  ;;  %v1249_v9 = vadd.f32 %v1248_v63, %v1247_v8 }
 0x19e   : > { %v1220_v10 = vadd.f32 %v1219_v26, %v1218_v50  ;;  %v1250_v12 = vrot.slane %v1249_v9, 4 }
 0x1a0   : > { %v1221_v54 = vrot.slane %v1220_v10, 2  ;;  %v1251_v16 = vadd.f32 %v1250_v12, %v1249_v9 }
 0x1a2   : > { %v1222_v18 = vadd.f32 %v1221_v54, %v1220_v10  ;;  %v1252_v21 = vrot.slane %v1251_v16, 2 }
 0x1a4   : > { %v1223_v15 = vrot.slane %v1222_v18, 1  ;;  %v1253_v22 = vadd.f32 %v1252_v21, %v1251_v16 }
 0x1a6   : > { %v1224_v23 = vadd.f32 %v1223_v15, %v1222_v18  ;;  %v1254_v36 = vrot.slane %v1253_v22, 1 }
 0x1a8   : > { %1226 = vst.msk [vmem:[%s226_s29] sm:$0x1] %vm1225_vm13, %v1224_v23  ;;  %v1255_v45 = vadd.f32 %v1254_v36, %v1253_v22 }
 0x1aa   : > { %1256 = vst.msk [vmem:[%s226_s29 + $0x1] sm:$0x1] %vm1225_vm13, %v1255_v45 }
 0x1ab PF: > { %s14_s14 = sadd.s32 1, %s1615_s14   ;;  %s2147_s12 = smov %s1611_s13 }
 0x1ac   : > { %p11_p5 = scmp.ge.s32.totalorder %s14_s14, 4   ;;  %s2148_s13 = smov %s2150_s15 }
 0x1ae   :  { %13 = sbr.rel (!%p11_p5) target bundleno = 2 (0x2), region = 72 }

</bundles_post_ra>
